<compile_context>
chip_gen: v6e
topology: v6e:2x2x1
jax: 0.10.0
libtpu: 0.0.40
codegen_flags: <defaults>
</compile_context>

<pallas_src>
import functools

import jax
import jax.numpy as jnp
from jax import lax
from jax.experimental import pallas as pl
from jax.experimental.pallas import tpu as pltpu

# ----------------------- configuration (opt) -----------------------
VOCAB_SIZE = 100
VOCAB_PAD = 128          # vocab padded to a power of two for the multi-hot trick
PAD_IDX = 0
EMBED_SIZE = 32          # embed_size
REGION_WORDS = 4         # opt.region_words
R_EMB = 32               # opt.r_emb  (LSTM hidden size)
RCNN_OUT = 320           # regional feature dim (fixed: nn.LSTM(320, r_emb))
NUM_CLASSES = 8          # output dim of the injected `fc`
SEQ_LEN = 16             # story length (multiple of REGION_WORDS)
Q_LEN = 8                # question length (<= 36, code slices [:36])
BATCH = 2
OPT_TEXT = True          # opt.text -> fc_input = r_emb (no feature concat)


# ----------------------- fused forward kernel -----------------------
def _holistic_fused_kernel(
    ids_ref,                       # (NT, RW) int32; row = t*B + b, question regions
                                   #   first; ids pre-offset by word_pos * VOCAB_PAD
    qfull_ref, sfull_ref,          # (RW*Vp, 5H) bf16  folded embed@rcnn@[W_ih | r_w]
    qb_ref, sb_ref,                # (1, 5H) f32       folded biases (incl. b_lstm)
    h0_ref, c0_ref,                # (B, H) f32
    whh_ref,                       # (H, 4H) bf16      gate order (i, f, o, g)
    hw_ref, gb_ref,                # (H, H) f32, (1, H) f32  (gb = r_w.b + h_w.b)
    fcw_ref, fcb_ref,              # (H, C) f32, (1, C) f32
    out_ref,                       # (B, C) f32
    *, B, H, R, n_q, v_pad,
):
    f32, bf16 = jnp.float32, jnp.bfloat16

    ids = ids_ref[...]                       # (NT, RW)
    rww = ids.shape[1]
    width = rww * v_pad
    nq = n_q * B

    def multihot(ids_blk):
        n = ids_blk.shape[0]
        col = lax.broadcasted_iota(jnp.int32, (n, width), 1)
        m = jnp.zeros((n, width), bf16)
        for j in range(rww):                 # ids already carry the j*v_pad offset
            m = m + (ids_blk[:, j:j + 1] == col).astype(bf16)
        return m

    # One MXU pass per branch gives LSTM gate pre-activations (cols [0, 4H)) and
    # the r_w gating projection (cols [4H, 5H)) for every timestep at once.
    gq = (jnp.dot(multihot(ids[:nq]), qfull_ref[...],
                  preferred_element_type=f32) + qb_ref[...])        # (n_q*B, 5H)
    gs = (jnp.dot(multihot(ids[nq:]), sfull_ref[...],
                  preferred_element_type=f32) + sb_ref[...])        # (n_s*B, 5H)

    # r_output @ r_w  ==  mean over regions of the folded extra columns
    # (off the recurrence critical path; tiny static-slice adds).
    rsum = jnp.zeros((B, H), f32)
    for t in range(n_q):
        rsum = rsum + gq[t * B:(t + 1) * B, 4 * H:]
    for t in range(R - n_q):
        rsum = rsum + gs[t * B:(t + 1) * B, 4 * H:]

    # ---- fully unrolled LSTM recurrence; state lives in vregs ----
    whh = whh_ref[...]                        # hoisted: loaded once for all steps
    h = h0_ref[...]
    c = c0_ref[...]
    hsum = jnp.zeros((B, H), f32)
    for t in range(R):
        if t < n_q:                           # static split (question vs story)
            gin = gq[t * B:(t + 1) * B, :4 * H]
        else:
            ts = t - n_q
            gin = gs[ts * B:(ts + 1) * B, :4 * H]
        g = gin + jnp.dot(h.astype(bf16), whh, preferred_element_type=f32)
        sg = jax.nn.sigmoid(g[:, :3 * H])     # i, f, o  (contiguous lane range)
        cg = jnp.tanh(g[:, 3 * H:])           # cell candidate
        i_g = sg[:, :H]
        f_g = sg[:, H:2 * H]
        o_g = sg[:, 2 * H:3 * H]
        c = f_g * c + i_g * cg
        h = o_g * jnp.tanh(c)
        hsum = hsum + h

    # ---- gating + final fc (opt.text=True -> fc_input = gated h_mean) ----
    inv_r = 1.0 / R
    h_mean = hsum * inv_r                                            # h_output.mean(1)
    gate = jax.nn.sigmoid(
        rsum * inv_r                                                 # r_w(r_emb.mean(1))
        + jnp.dot(h_mean, hw_ref[...], preferred_element_type=f32)   # h_w(h_mean)
        + gb_ref[...])
    gated = gate * h_mean                                            # (B, H)
    out_ref[...] = (jnp.dot(gated, fcw_ref[...], preferred_element_type=f32)
                    + fcb_ref[...])


def _full_spec(arr):
    nd = arr.ndim
    return pl.BlockSpec(arr.shape, lambda i, _nd=nd: (0,) * _nd)


def holistic_forward_fused(ids_all, h0, c0, p, *, n_q):
    """ids_all: (R*B, RW) int32 (question regions first, time-major rows,
    ids pre-offset by word_position * VOCAB_PAD)."""
    B, H = h0.shape
    C = p["fc_w"].shape[1]
    NT, RW = ids_all.shape
    R = NT // B

    kernel = functools.partial(
        _holistic_fused_kernel, B=B, H=H, R=R, n_q=n_q, v_pad=VOCAB_PAD)

    args = (ids_all,
            p["q_full"], p["s_full"], p["q_bias"], p["s_bias"],
            h0, c0,
            p["w_hh"],
            p["hw_w"], p["gate_b"],
            p["fc_w"], p["fc_b"])

    flops = (2 * NT * (RW * VOCAB_PAD) * (5 * H)        # folded projections
             + R * 2 * B * H * (4 * H)                  # recurrence h @ W_hh
             + 2 * B * H * H + 2 * B * H * C)           # gating + fc
    transcendentals = R * B * 5 * H + B * H
    bytes_accessed = sum(int(a.size) * a.dtype.itemsize for a in args) + B * C * 4

    return pl.pallas_call(
        kernel,
        out_shape=jax.ShapeDtypeStruct((B, C), jnp.float32),
        grid=(1,),
        in_specs=[_full_spec(a) for a in args],
        out_specs=pl.BlockSpec((B, C), lambda i: (0, 0)),
        compiler_params=pltpu.CompilerParams(
            dimension_semantics=("arbitrary",)),
        cost_estimate=pl.CostEstimate(
            flops=int(flops),
            transcendentals=int(transcendentals),
            bytes_accessed=int(bytes_accessed)),
    )(*args)


# ----------------------- params (with host-side algebraic folding) -----------------------
def init_params(key):
    assert VOCAB_SIZE <= VOCAB_PAD, "token ids must fit inside one VOCAB_PAD block"
    ks = jax.random.split(key, 14)
    H, D, E = R_EMB, RCNN_OUT, EMBED_SIZE
    RW, C, V, VP = REGION_WORDS, NUM_CLASSES, VOCAB_SIZE, VOCAB_PAD

    def nrm(k, shape, scale=0.05):
        return scale * jax.random.normal(k, shape, dtype=jnp.float32)

    embed = nrm(ks[0], (V, E)).at[PAD_IDX].set(0.0)     # padding_idx row -> zeros
    # Pad vocab to VP and tile block-diagonally: a region's multi-hot row (RW ones)
    # @ embed_bd yields the concatenation of its RW word embeddings, i.e. the
    # flattened Conv1d(k=stride=RW) input of shape (RW*E,).
    embed_bd = jnp.zeros((RW * VP, RW * E), jnp.float32)
    for j in range(RW):
        embed_bd = embed_bd.at[j * VP:j * VP + V, j * E:(j + 1) * E].set(embed)

    # s_rcnn / q_rcnn stand-ins: Conv1d(E, 320, k=RW, stride=RW) == linear
    q_rcnn_w, q_rcnn_b = nrm(ks[1], (RW * E, D)), nrm(ks[2], (1, D))
    s_rcnn_w, s_rcnn_b = nrm(ks[3], (RW * E, D)), nrm(ks[4], (1, D))

    # LSTM(320, H), PyTorch gate order (i, f, g, o); bias = b_ih + b_hh combined.
    w_ih = nrm(ks[5], (D, 4 * H))
    w_hh = nrm(ks[6], (H, 4 * H))
    b_lstm = nrm(ks[7], (1, 4 * H))
    # Permute gate columns to (i, f, o, g) so sigmoid/tanh act on contiguous lanes.
    perm = jnp.concatenate([jnp.arange(0, 2 * H),       # i, f
                            jnp.arange(3 * H, 4 * H),   # o
                            jnp.arange(2 * H, 3 * H)])  # g
    w_ih_p, w_hh_p, b_lstm_p = w_ih[:, perm], w_hh[:, perm], b_lstm[:, perm]

    rw_w, rw_b = nrm(ks[8], (D, H)), nrm(ks[9], (1, H))        # self.r_w
    hw_w, hw_b = nrm(ks[10], (H, H)), nrm(ks[11], (1, H))      # self.h_w
    fc_w, fc_b = nrm(ks[12], (H, C)), nrm(ks[13], (1, C))      # injected fc

    # ---- fold all pre-recurrence linear maps into one table per branch (f32) ----
    w_ext = jnp.concatenate([w_ih_p, rw_w], axis=1)                  # (D, 5H)
    q_full = embed_bd @ q_rcnn_w @ w_ext                             # (RW*VP, 5H)
    s_full = embed_bd @ s_rcnn_w @ w_ext
    b_ext = jnp.concatenate([b_lstm_p, jnp.zeros((1, H), jnp.float32)], axis=1)
    q_bias = q_rcnn_b @ w_ext + b_ext                                # (1, 5H)
    s_bias = s_rcnn_b @ w_ext + b_ext

    return {
        "q_full": q_full.astype(jnp.bfloat16),
        "s_full": s_full.astype(jnp.bfloat16),
        "q_bias": q_bias,
        "s_bias": s_bias,
        "w_hh": w_hh_p.astype(jnp.bfloat16),
        "hw_w": hw_w,
        "gate_b": rw_b + hw_b,       # single bias for the fused gate sigmoid
        "fc_w": fc_w,
        "fc_b": fc_b,
    }


# ----------------------- wrapper (plain JAX, jitted) -----------------------
def _arrange_regions(ids, n_reg, rw):
    """(L, B) seq-major ids -> (n_reg*B, rw) rows, row index = region*B + batch."""
    _, B = ids.shape
    return (ids.T.reshape(B, n_reg, rw)
            .transpose(1, 0, 2).reshape(n_reg * B, rw).astype(jnp.int32))


@jax.jit
def holistic_reader_forward(text_ids, question_ids, h0, c0, params):
    rw = REGION_WORDS
    # opt.region_nums == 0: trim text to a multiple of region_words
    ls = text_ids.shape[0] - text_ids.shape[0] % rw
    text_ids = text_ids[:ls]
    question_ids = question_ids[:36]
    lq = question_ids.shape[0] - question_ids.shape[0] % rw
    question_ids = question_ids[:lq]

    n_s, n_q = ls // rw, lq // rw
    assert n_q >= 1 and n_s >= 1
    ids_all = jnp.concatenate(
        [_arrange_regions(question_ids, n_q, rw),
         _arrange_regions(text_ids, n_s, rw)], axis=0)   # question regions first

    # OOV / range guard: an id >= VOCAB_PAD would alias into the next word-position
    # block of the folded table -> map anything out of range to PAD_IDX.
    ids_all = jnp.where((ids_all >= 0) & (ids_all < VOCAB_SIZE), ids_all, PAD_IDX)
    # Pre-add word-position offsets so the in-kernel multi-hot compare is a bare ==.
    ids_all = ids_all + jnp.arange(rw, dtype=jnp.int32)[None, :] * VOCAB_PAD

    return holistic_forward_fused(ids_all, h0, c0, params, n_q=n_q)


# ----------------------- main -----------------------
if __name__ == "__main__":
    key = jax.random.PRNGKey(0)
    k_text, k_q, k_h, k_c, k_par = jax.random.split(key, 5)

    text_ids = jax.random.randint(k_text, (SEQ_LEN, BATCH), 1, VOCAB_SIZE)
    question_ids = jax.random.randint(k_q, (Q_LEN, BATCH), 1, VOCAB_SIZE)
    # PyTorch draws h, c ~ N(0, 1) of shape (1, batch, r_emb); layer dim squeezed.
    h0 = jax.random.normal(k_h, (BATCH, R_EMB), dtype=jnp.float32)
    c0 = jax.random.normal(k_c, (BATCH, R_EMB), dtype=jnp.float32)

    params = init_params(k_par)

    out = holistic_reader_forward(text_ids, question_ids, h0, c0, params)
    out = jax.block_until_ready(out)
    assert out.shape == (BATCH, NUM_CLASSES)
    assert bool(jnp.all(jnp.isfinite(out)))
    print("KERNEL_OK")
</pallas_src>

<mosaic_0001>
module attributes {stable_mosaic.version = 11 : i64} {
  func.func @_holistic_fused_kernel(%arg0: i32, %arg1: memref<12x4xi32, #tpu.memory_space<vmem>>, %arg2: memref<512x160xbf16, #tpu.memory_space<vmem>>, %arg3: memref<512x160xbf16, #tpu.memory_space<vmem>>, %arg4: memref<1x160xf32, #tpu.memory_space<vmem>>, %arg5: memref<1x160xf32, #tpu.memory_space<vmem>>, %arg6: memref<2x32xf32, #tpu.memory_space<vmem>>, %arg7: memref<2x32xf32, #tpu.memory_space<vmem>>, %arg8: memref<32x128xbf16, #tpu.memory_space<vmem>>, %arg9: memref<32x32xf32, #tpu.memory_space<vmem>>, %arg10: memref<1x32xf32, #tpu.memory_space<vmem>>, %arg11: memref<32x8xf32, #tpu.memory_space<vmem>>, %arg12: memref<1x8xf32, #tpu.memory_space<vmem>>, %arg13: memref<2x8xf32, #tpu.memory_space<vmem>>) attributes {dimension_semantics = [#tpu.dimension_semantics<arbitrary>], iteration_bounds = array<i64: 1>, scalar_prefetch = 0 : i64, scratch_operands = 0 : i64, tpu.core_type = #tpu.core_type<tc>, window_params = [{pipeline_mode = #tpu.pipeline_mode<synchronous>, transform_indices = @transform_0, window_bounds = array<i64: 12, 4>}, {pipeline_mode = #tpu.pipeline_mode<synchronous>, transform_indices = @transform_1, window_bounds = array<i64: 512, 160>}, {pipeline_mode = #tpu.pipeline_mode<synchronous>, transform_indices = @transform_2, window_bounds = array<i64: 512, 160>}, {pipeline_mode = #tpu.pipeline_mode<synchronous>, transform_indices = @transform_3, window_bounds = array<i64: 1, 160>}, {pipeline_mode = #tpu.pipeline_mode<synchronous>, transform_indices = @transform_4, window_bounds = array<i64: 1, 160>}, {pipeline_mode = #tpu.pipeline_mode<synchronous>, transform_indices = @transform_5, window_bounds = array<i64: 2, 32>}, {pipeline_mode = #tpu.pipeline_mode<synchronous>, transform_indices = @transform_6, window_bounds = array<i64: 2, 32>}, {pipeline_mode = #tpu.pipeline_mode<synchronous>, transform_indices = @transform_7, window_bounds = array<i64: 32, 128>}, {pipeline_mode = #tpu.pipeline_mode<synchronous>, transform_indices = @transform_8, window_bounds = array<i64: 32, 32>}, {pipeline_mode = #tpu.pipeline_mode<synchronous>, transform_indices = @transform_9, window_bounds = array<i64: 1, 32>}, {pipeline_mode = #tpu.pipeline_mode<synchronous>, transform_indices = @transform_10, window_bounds = array<i64: 32, 8>}, {pipeline_mode = #tpu.pipeline_mode<synchronous>, transform_indices = @transform_11, window_bounds = array<i64: 1, 8>}, {pipeline_mode = #tpu.pipeline_mode<synchronous>, transform_indices = @transform_12, window_bounds = array<i64: 2, 8>}]} {
    %c0 = arith.constant 0 : index
    %c0_0 = arith.constant 0 : index
    %0 = vector.load %arg1[%c0, %c0_0] : memref<12x4xi32, #tpu.memory_space<vmem>>, vector<12x4xi32>
    %1 = vector.extract_strided_slice %0 {offsets = [0, 0], sizes = [4, 4], strides = [1, 1]} : vector<12x4xi32> to vector<4x4xi32>
    %2 = tpu.iota {dimensions = array<i32: 1>} : vector<4x512xi32>
    %cst = arith.constant 0.000000e+00 : bf16
    %3 = vector.broadcast %cst : bf16 to vector<4x512xbf16>
    %4 = vector.extract_strided_slice %1 {offsets = [0, 0], sizes = [4, 1], strides = [1, 1]} : vector<4x4xi32> to vector<4x1xi32>
    %5 = vector.broadcast %4 : vector<4x1xi32> to vector<4x512xi32>
    %6 = arith.cmpi eq, %5, %2 : vector<4x512xi32>
    %7 = arith.extui %6 : vector<4x512xi1> to vector<4x512xi32>
    %8 = arith.sitofp %7 : vector<4x512xi32> to vector<4x512xf32>
    %9 = arith.truncf %8 : vector<4x512xf32> to vector<4x512xbf16>
    %10 = arith.addf %3, %9 : vector<4x512xbf16>
    %11 = vector.extract_strided_slice %1 {offsets = [0, 1], sizes = [4, 1], strides = [1, 1]} : vector<4x4xi32> to vector<4x1xi32>
    %12 = vector.broadcast %11 : vector<4x1xi32> to vector<4x512xi32>
    %13 = arith.cmpi eq, %12, %2 : vector<4x512xi32>
    %14 = arith.extui %13 : vector<4x512xi1> to vector<4x512xi32>
    %15 = arith.sitofp %14 : vector<4x512xi32> to vector<4x512xf32>
    %16 = arith.truncf %15 : vector<4x512xf32> to vector<4x512xbf16>
    %17 = arith.addf %10, %16 : vector<4x512xbf16>
    %18 = vector.extract_strided_slice %1 {offsets = [0, 2], sizes = [4, 1], strides = [1, 1]} : vector<4x4xi32> to vector<4x1xi32>
    %19 = vector.broadcast %18 : vector<4x1xi32> to vector<4x512xi32>
    %20 = arith.cmpi eq, %19, %2 : vector<4x512xi32>
    %21 = arith.extui %20 : vector<4x512xi1> to vector<4x512xi32>
    %22 = arith.sitofp %21 : vector<4x512xi32> to vector<4x512xf32>
    %23 = arith.truncf %22 : vector<4x512xf32> to vector<4x512xbf16>
    %24 = arith.addf %17, %23 : vector<4x512xbf16>
    %25 = vector.extract_strided_slice %1 {offsets = [0, 3], sizes = [4, 1], strides = [1, 1]} : vector<4x4xi32> to vector<4x1xi32>
    %26 = vector.broadcast %25 : vector<4x1xi32> to vector<4x512xi32>
    %27 = arith.cmpi eq, %26, %2 : vector<4x512xi32>
    %28 = arith.extui %27 : vector<4x512xi1> to vector<4x512xi32>
    %29 = arith.sitofp %28 : vector<4x512xi32> to vector<4x512xf32>
    %30 = arith.truncf %29 : vector<4x512xf32> to vector<4x512xbf16>
    %31 = arith.addf %24, %30 : vector<4x512xbf16>
    %c0_1 = arith.constant 0 : index
    %c0_2 = arith.constant 0 : index
    %32 = vector.load %arg2[%c0_1, %c0_2] : memref<512x160xbf16, #tpu.memory_space<vmem>>, vector<512x160xbf16>
    %cst_3 = arith.constant dense<0.000000e+00> : vector<4x160xf32>
    %33 = tpu.matmul %31, %32, %cst_3 {dimension_numbers = #tpu.dot_dimension_numbers<[1], [0], [0], [1], [0, 0, 1, 1], [], []>} : vector<4x512xbf16>, vector<512x160xbf16>, vector<4x160xf32> -> vector<4x160xf32>
    %c0_4 = arith.constant 0 : index
    %c0_5 = arith.constant 0 : index
    %34 = vector.load %arg4[%c0_4, %c0_5] : memref<1x160xf32, #tpu.memory_space<vmem>>, vector<1x160xf32>
    %35 = vector.broadcast %34 : vector<1x160xf32> to vector<4x160xf32>
    %36 = arith.addf %33, %35 : vector<4x160xf32>
    %37 = vector.extract_strided_slice %0 {offsets = [4, 0], sizes = [8, 4], strides = [1, 1]} : vector<12x4xi32> to vector<8x4xi32>
    %38 = tpu.iota {dimensions = array<i32: 1>} : vector<8x512xi32>
    %cst_6 = arith.constant 0.000000e+00 : bf16
    %39 = vector.broadcast %cst_6 : bf16 to vector<8x512xbf16>
    %40 = vector.extract_strided_slice %37 {offsets = [0, 0], sizes = [8, 1], strides = [1, 1]} : vector<8x4xi32> to vector<8x1xi32>
    %41 = vector.broadcast %40 : vector<8x1xi32> to vector<8x512xi32>
    %42 = arith.cmpi eq, %41, %38 : vector<8x512xi32>
    %43 = arith.extui %42 : vector<8x512xi1> to vector<8x512xi32>
    %44 = arith.sitofp %43 : vector<8x512xi32> to vector<8x512xf32>
    %45 = arith.truncf %44 : vector<8x512xf32> to vector<8x512xbf16>
    %46 = arith.addf %39, %45 : vector<8x512xbf16>
    %47 = vector.extract_strided_slice %37 {offsets = [0, 1], sizes = [8, 1], strides = [1, 1]} : vector<8x4xi32> to vector<8x1xi32>
    %48 = vector.broadcast %47 : vector<8x1xi32> to vector<8x512xi32>
    %49 = arith.cmpi eq, %48, %38 : vector<8x512xi32>
    %50 = arith.extui %49 : vector<8x512xi1> to vector<8x512xi32>
    %51 = arith.sitofp %50 : vector<8x512xi32> to vector<8x512xf32>
    %52 = arith.truncf %51 : vector<8x512xf32> to vector<8x512xbf16>
    %53 = arith.addf %46, %52 : vector<8x512xbf16>
    %54 = vector.extract_strided_slice %37 {offsets = [0, 2], sizes = [8, 1], strides = [1, 1]} : vector<8x4xi32> to vector<8x1xi32>
    %55 = vector.broadcast %54 : vector<8x1xi32> to vector<8x512xi32>
    %56 = arith.cmpi eq, %55, %38 : vector<8x512xi32>
    %57 = arith.extui %56 : vector<8x512xi1> to vector<8x512xi32>
    %58 = arith.sitofp %57 : vector<8x512xi32> to vector<8x512xf32>
    %59 = arith.truncf %58 : vector<8x512xf32> to vector<8x512xbf16>
    %60 = arith.addf %53, %59 : vector<8x512xbf16>
    %61 = vector.extract_strided_slice %37 {offsets = [0, 3], sizes = [8, 1], strides = [1, 1]} : vector<8x4xi32> to vector<8x1xi32>
    %62 = vector.broadcast %61 : vector<8x1xi32> to vector<8x512xi32>
    %63 = arith.cmpi eq, %62, %38 : vector<8x512xi32>
    %64 = arith.extui %63 : vector<8x512xi1> to vector<8x512xi32>
    %65 = arith.sitofp %64 : vector<8x512xi32> to vector<8x512xf32>
    %66 = arith.truncf %65 : vector<8x512xf32> to vector<8x512xbf16>
    %67 = arith.addf %60, %66 : vector<8x512xbf16>
    %c0_7 = arith.constant 0 : index
    %c0_8 = arith.constant 0 : index
    %68 = vector.load %arg3[%c0_7, %c0_8] : memref<512x160xbf16, #tpu.memory_space<vmem>>, vector<512x160xbf16>
    %cst_9 = arith.constant dense<0.000000e+00> : vector<8x160xf32>
    %69 = tpu.matmul %67, %68, %cst_9 {dimension_numbers = #tpu.dot_dimension_numbers<[1], [0], [0], [1], [0, 0, 1, 1], [], []>} : vector<8x512xbf16>, vector<512x160xbf16>, vector<8x160xf32> -> vector<8x160xf32>
    %c0_10 = arith.constant 0 : index
    %c0_11 = arith.constant 0 : index
    %70 = vector.load %arg5[%c0_10, %c0_11] : memref<1x160xf32, #tpu.memory_space<vmem>>, vector<1x160xf32>
    %71 = vector.broadcast %70 : vector<1x160xf32> to vector<8x160xf32>
    %72 = arith.addf %69, %71 : vector<8x160xf32>
    %cst_12 = arith.constant 0.000000e+00 : f32
    %73 = vector.broadcast %cst_12 : f32 to vector<2x32xf32>
    %74 = vector.extract_strided_slice %36 {offsets = [0, 128], sizes = [2, 32], strides = [1, 1]} : vector<4x160xf32> to vector<2x32xf32>
    %75 = arith.addf %73, %74 : vector<2x32xf32>
    %76 = vector.extract_strided_slice %36 {offsets = [2, 128], sizes = [2, 32], strides = [1, 1]} : vector<4x160xf32> to vector<2x32xf32>
    %77 = arith.addf %75, %76 : vector<2x32xf32>
    %78 = vector.extract_strided_slice %72 {offsets = [0, 128], sizes = [2, 32], strides = [1, 1]} : vector<8x160xf32> to vector<2x32xf32>
    %79 = arith.addf %77, %78 : vector<2x32xf32>
    %80 = vector.extract_strided_slice %72 {offsets = [2, 128], sizes = [2, 32], strides = [1, 1]} : vector<8x160xf32> to vector<2x32xf32>
    %81 = arith.addf %79, %80 : vector<2x32xf32>
    %82 = vector.extract_strided_slice %72 {offsets = [4, 128], sizes = [2, 32], strides = [1, 1]} : vector<8x160xf32> to vector<2x32xf32>
    %83 = arith.addf %81, %82 : vector<2x32xf32>
    %84 = vector.extract_strided_slice %72 {offsets = [6, 128], sizes = [2, 32], strides = [1, 1]} : vector<8x160xf32> to vector<2x32xf32>
    %85 = arith.addf %83, %84 : vector<2x32xf32>
    %c0_13 = arith.constant 0 : index
    %c0_14 = arith.constant 0 : index
    %86 = vector.load %arg8[%c0_13, %c0_14] : memref<32x128xbf16, #tpu.memory_space<vmem>>, vector<32x128xbf16>
    %c0_15 = arith.constant 0 : index
    %c0_16 = arith.constant 0 : index
    %87 = vector.load %arg6[%c0_15, %c0_16] : memref<2x32xf32, #tpu.memory_space<vmem>>, vector<2x32xf32>
    %c0_17 = arith.constant 0 : index
    %c0_18 = arith.constant 0 : index
    %88 = vector.load %arg7[%c0_17, %c0_18] : memref<2x32xf32, #tpu.memory_space<vmem>>, vector<2x32xf32>
    %cst_19 = arith.constant 0.000000e+00 : f32
    %89 = vector.broadcast %cst_19 : f32 to vector<2x32xf32>
    %90 = vector.extract_strided_slice %36 {offsets = [0, 0], sizes = [2, 128], strides = [1, 1]} : vector<4x160xf32> to vector<2x128xf32>
    %91 = arith.truncf %87 : vector<2x32xf32> to vector<2x32xbf16>
    %cst_20 = arith.constant dense<0.000000e+00> : vector<2x128xf32>
    %92 = tpu.matmul %91, %86, %cst_20 {dimension_numbers = #tpu.dot_dimension_numbers<[1], [0], [0], [1], [0, 0, 1, 1], [], []>} : vector<2x32xbf16>, vector<32x128xbf16>, vector<2x128xf32> -> vector<2x128xf32>
    %93 = arith.addf %90, %92 : vector<2x128xf32>
    %94 = vector.extract_strided_slice %93 {offsets = [0, 0], sizes = [2, 96], strides = [1, 1]} : vector<2x128xf32> to vector<2x96xf32>
    %95 = arith.negf %94 : vector<2x96xf32>
    %96 = math.exp %95 : vector<2x96xf32>
    %cst_21 = arith.constant 1.000000e+00 : f32
    %97 = vector.broadcast %cst_21 : f32 to vector<2x96xf32>
    %98 = arith.addf %97, %96 : vector<2x96xf32>
    %99 = arith.divf %97, %98 : vector<2x96xf32>
    %100 = vector.extract_strided_slice %93 {offsets = [0, 96], sizes = [2, 32], strides = [1, 1]} : vector<2x128xf32> to vector<2x32xf32>
    %101 = math.tanh %100 : vector<2x32xf32>
    %102 = vector.extract_strided_slice %99 {offsets = [0, 0], sizes = [2, 32], strides = [1, 1]} : vector<2x96xf32> to vector<2x32xf32>
    %103 = vector.extract_strided_slice %99 {offsets = [0, 32], sizes = [2, 32], strides = [1, 1]} : vector<2x96xf32> to vector<2x32xf32>
    %104 = vector.extract_strided_slice %99 {offsets = [0, 64], sizes = [2, 32], strides = [1, 1]} : vector<2x96xf32> to vector<2x32xf32>
    %105 = arith.mulf %103, %88 : vector<2x32xf32>
    %106 = arith.mulf %102, %101 : vector<2x32xf32>
    %107 = arith.addf %105, %106 : vector<2x32xf32>
    %108 = math.tanh %107 : vector<2x32xf32>
    %109 = arith.mulf %104, %108 : vector<2x32xf32>
    %110 = arith.addf %89, %109 : vector<2x32xf32>
    %111 = vector.extract_strided_slice %36 {offsets = [2, 0], sizes = [2, 128], strides = [1, 1]} : vector<4x160xf32> to vector<2x128xf32>
    %112 = arith.truncf %109 : vector<2x32xf32> to vector<2x32xbf16>
    %cst_22 = arith.constant dense<0.000000e+00> : vector<2x128xf32>
    %113 = tpu.matmul %112, %86, %cst_22 {dimension_numbers = #tpu.dot_dimension_numbers<[1], [0], [0], [1], [0, 0, 1, 1], [], []>} : vector<2x32xbf16>, vector<32x128xbf16>, vector<2x128xf32> -> vector<2x128xf32>
    %114 = arith.addf %111, %113 : vector<2x128xf32>
    %115 = vector.extract_strided_slice %114 {offsets = [0, 0], sizes = [2, 96], strides = [1, 1]} : vector<2x128xf32> to vector<2x96xf32>
    %116 = arith.negf %115 : vector<2x96xf32>
    %117 = math.exp %116 : vector<2x96xf32>
    %cst_23 = arith.constant 1.000000e+00 : f32
    %118 = vector.broadcast %cst_23 : f32 to vector<2x96xf32>
    %119 = arith.addf %118, %117 : vector<2x96xf32>
    %120 = arith.divf %118, %119 : vector<2x96xf32>
    %121 = vector.extract_strided_slice %114 {offsets = [0, 96], sizes = [2, 32], strides = [1, 1]} : vector<2x128xf32> to vector<2x32xf32>
    %122 = math.tanh %121 : vector<2x32xf32>
    %123 = vector.extract_strided_slice %120 {offsets = [0, 0], sizes = [2, 32], strides = [1, 1]} : vector<2x96xf32> to vector<2x32xf32>
    %124 = vector.extract_strided_slice %120 {offsets = [0, 32], sizes = [2, 32], strides = [1, 1]} : vector<2x96xf32> to vector<2x32xf32>
    %125 = vector.extract_strided_slice %120 {offsets = [0, 64], sizes = [2, 32], strides = [1, 1]} : vector<2x96xf32> to vector<2x32xf32>
    %126 = arith.mulf %124, %107 : vector<2x32xf32>
    %127 = arith.mulf %123, %122 : vector<2x32xf32>
    %128 = arith.addf %126, %127 : vector<2x32xf32>
    %129 = math.tanh %128 : vector<2x32xf32>
    %130 = arith.mulf %125, %129 : vector<2x32xf32>
    %131 = arith.addf %110, %130 : vector<2x32xf32>
    %132 = vector.extract_strided_slice %72 {offsets = [0, 0], sizes = [2, 128], strides = [1, 1]} : vector<8x160xf32> to vector<2x128xf32>
    %133 = arith.truncf %130 : vector<2x32xf32> to vector<2x32xbf16>
    %cst_24 = arith.constant dense<0.000000e+00> : vector<2x128xf32>
    %134 = tpu.matmul %133, %86, %cst_24 {dimension_numbers = #tpu.dot_dimension_numbers<[1], [0], [0], [1], [0, 0, 1, 1], [], []>} : vector<2x32xbf16>, vector<32x128xbf16>, vector<2x128xf32> -> vector<2x128xf32>
    %135 = arith.addf %132, %134 : vector<2x128xf32>
    %136 = vector.extract_strided_slice %135 {offsets = [0, 0], sizes = [2, 96], strides = [1, 1]} : vector<2x128xf32> to vector<2x96xf32>
    %137 = arith.negf %136 : vector<2x96xf32>
    %138 = math.exp %137 : vector<2x96xf32>
    %cst_25 = arith.constant 1.000000e+00 : f32
    %139 = vector.broadcast %cst_25 : f32 to vector<2x96xf32>
    %140 = arith.addf %139, %138 : vector<2x96xf32>
    %141 = arith.divf %139, %140 : vector<2x96xf32>
    %142 = vector.extract_strided_slice %135 {offsets = [0, 96], sizes = [2, 32], strides = [1, 1]} : vector<2x128xf32> to vector<2x32xf32>
    %143 = math.tanh %142 : vector<2x32xf32>
    %144 = vector.extract_strided_slice %141 {offsets = [0, 0], sizes = [2, 32], strides = [1, 1]} : vector<2x96xf32> to vector<2x32xf32>
    %145 = vector.extract_strided_slice %141 {offsets = [0, 32], sizes = [2, 32], strides = [1, 1]} : vector<2x96xf32> to vector<2x32xf32>
    %146 = vector.extract_strided_slice %141 {offsets = [0, 64], sizes = [2, 32], strides = [1, 1]} : vector<2x96xf32> to vector<2x32xf32>
    %147 = arith.mulf %145, %128 : vector<2x32xf32>
    %148 = arith.mulf %144, %143 : vector<2x32xf32>
    %149 = arith.addf %147, %148 : vector<2x32xf32>
    %150 = math.tanh %149 : vector<2x32xf32>
    %151 = arith.mulf %146, %150 : vector<2x32xf32>
    %152 = arith.addf %131, %151 : vector<2x32xf32>
    %153 = vector.extract_strided_slice %72 {offsets = [2, 0], sizes = [2, 128], strides = [1, 1]} : vector<8x160xf32> to vector<2x128xf32>
    %154 = arith.truncf %151 : vector<2x32xf32> to vector<2x32xbf16>
    %cst_26 = arith.constant dense<0.000000e+00> : vector<2x128xf32>
    %155 = tpu.matmul %154, %86, %cst_26 {dimension_numbers = #tpu.dot_dimension_numbers<[1], [0], [0], [1], [0, 0, 1, 1], [], []>} : vector<2x32xbf16>, vector<32x128xbf16>, vector<2x128xf32> -> vector<2x128xf32>
    %156 = arith.addf %153, %155 : vector<2x128xf32>
    %157 = vector.extract_strided_slice %156 {offsets = [0, 0], sizes = [2, 96], strides = [1, 1]} : vector<2x128xf32> to vector<2x96xf32>
    %158 = arith.negf %157 : vector<2x96xf32>
    %159 = math.exp %158 : vector<2x96xf32>
    %cst_27 = arith.constant 1.000000e+00 : f32
    %160 = vector.broadcast %cst_27 : f32 to vector<2x96xf32>
    %161 = arith.addf %160, %159 : vector<2x96xf32>
    %162 = arith.divf %160, %161 : vector<2x96xf32>
    %163 = vector.extract_strided_slice %156 {offsets = [0, 96], sizes = [2, 32], strides = [1, 1]} : vector<2x128xf32> to vector<2x32xf32>
    %164 = math.tanh %163 : vector<2x32xf32>
    %165 = vector.extract_strided_slice %162 {offsets = [0, 0], sizes = [2, 32], strides = [1, 1]} : vector<2x96xf32> to vector<2x32xf32>
    %166 = vector.extract_strided_slice %162 {offsets = [0, 32], sizes = [2, 32], strides = [1, 1]} : vector<2x96xf32> to vector<2x32xf32>
    %167 = vector.extract_strided_slice %162 {offsets = [0, 64], sizes = [2, 32], strides = [1, 1]} : vector<2x96xf32> to vector<2x32xf32>
    %168 = arith.mulf %166, %149 : vector<2x32xf32>
    %169 = arith.mulf %165, %164 : vector<2x32xf32>
    %170 = arith.addf %168, %169 : vector<2x32xf32>
    %171 = math.tanh %170 : vector<2x32xf32>
    %172 = arith.mulf %167, %171 : vector<2x32xf32>
    %173 = arith.addf %152, %172 : vector<2x32xf32>
    %174 = vector.extract_strided_slice %72 {offsets = [4, 0], sizes = [2, 128], strides = [1, 1]} : vector<8x160xf32> to vector<2x128xf32>
    %175 = arith.truncf %172 : vector<2x32xf32> to vector<2x32xbf16>
    %cst_28 = arith.constant dense<0.000000e+00> : vector<2x128xf32>
    %176 = tpu.matmul %175, %86, %cst_28 {dimension_numbers = #tpu.dot_dimension_numbers<[1], [0], [0], [1], [0, 0, 1, 1], [], []>} : vector<2x32xbf16>, vector<32x128xbf16>, vector<2x128xf32> -> vector<2x128xf32>
    %177 = arith.addf %174, %176 : vector<2x128xf32>
    %178 = vector.extract_strided_slice %177 {offsets = [0, 0], sizes = [2, 96], strides = [1, 1]} : vector<2x128xf32> to vector<2x96xf32>
    %179 = arith.negf %178 : vector<2x96xf32>
    %180 = math.exp %179 : vector<2x96xf32>
    %cst_29 = arith.constant 1.000000e+00 : f32
    %181 = vector.broadcast %cst_29 : f32 to vector<2x96xf32>
    %182 = arith.addf %181, %180 : vector<2x96xf32>
    %183 = arith.divf %181, %182 : vector<2x96xf32>
    %184 = vector.extract_strided_slice %177 {offsets = [0, 96], sizes = [2, 32], strides = [1, 1]} : vector<2x128xf32> to vector<2x32xf32>
    %185 = math.tanh %184 : vector<2x32xf32>
    %186 = vector.extract_strided_slice %183 {offsets = [0, 0], sizes = [2, 32], strides = [1, 1]} : vector<2x96xf32> to vector<2x32xf32>
    %187 = vector.extract_strided_slice %183 {offsets = [0, 32], sizes = [2, 32], strides = [1, 1]} : vector<2x96xf32> to vector<2x32xf32>
    %188 = vector.extract_strided_slice %183 {offsets = [0, 64], sizes = [2, 32], strides = [1, 1]} : vector<2x96xf32> to vector<2x32xf32>
    %189 = arith.mulf %187, %170 : vector<2x32xf32>
    %190 = arith.mulf %186, %185 : vector<2x32xf32>
    %191 = arith.addf %189, %190 : vector<2x32xf32>
    %192 = math.tanh %191 : vector<2x32xf32>
    %193 = arith.mulf %188, %192 : vector<2x32xf32>
    %194 = arith.addf %173, %193 : vector<2x32xf32>
    %195 = vector.extract_strided_slice %72 {offsets = [6, 0], sizes = [2, 128], strides = [1, 1]} : vector<8x160xf32> to vector<2x128xf32>
    %196 = arith.truncf %193 : vector<2x32xf32> to vector<2x32xbf16>
    %cst_30 = arith.constant dense<0.000000e+00> : vector<2x128xf32>
    %197 = tpu.matmul %196, %86, %cst_30 {dimension_numbers = #tpu.dot_dimension_numbers<[1], [0], [0], [1], [0, 0, 1, 1], [], []>} : vector<2x32xbf16>, vector<32x128xbf16>, vector<2x128xf32> -> vector<2x128xf32>
    %198 = arith.addf %195, %197 : vector<2x128xf32>
    %199 = vector.extract_strided_slice %198 {offsets = [0, 0], sizes = [2, 96], strides = [1, 1]} : vector<2x128xf32> to vector<2x96xf32>
    %200 = arith.negf %199 : vector<2x96xf32>
    %201 = math.exp %200 : vector<2x96xf32>
    %cst_31 = arith.constant 1.000000e+00 : f32
    %202 = vector.broadcast %cst_31 : f32 to vector<2x96xf32>
    %203 = arith.addf %202, %201 : vector<2x96xf32>
    %204 = arith.divf %202, %203 : vector<2x96xf32>
    %205 = vector.extract_strided_slice %198 {offsets = [0, 96], sizes = [2, 32], strides = [1, 1]} : vector<2x128xf32> to vector<2x32xf32>
    %206 = math.tanh %205 : vector<2x32xf32>
    %207 = vector.extract_strided_slice %204 {offsets = [0, 0], sizes = [2, 32], strides = [1, 1]} : vector<2x96xf32> to vector<2x32xf32>
    %208 = vector.extract_strided_slice %204 {offsets = [0, 32], sizes = [2, 32], strides = [1, 1]} : vector<2x96xf32> to vector<2x32xf32>
    %209 = vector.extract_strided_slice %204 {offsets = [0, 64], sizes = [2, 32], strides = [1, 1]} : vector<2x96xf32> to vector<2x32xf32>
    %210 = arith.mulf %208, %191 : vector<2x32xf32>
    %211 = arith.mulf %207, %206 : vector<2x32xf32>
    %212 = arith.addf %210, %211 : vector<2x32xf32>
    %213 = math.tanh %212 : vector<2x32xf32>
    %214 = arith.mulf %209, %213 : vector<2x32xf32>
    %215 = arith.addf %194, %214 : vector<2x32xf32>
    %cst_32 = arith.constant 0.166666672 : f32
    %216 = vector.broadcast %cst_32 : f32 to vector<2x32xf32>
    %217 = arith.mulf %215, %216 : vector<2x32xf32>
    %cst_33 = arith.constant 0.166666672 : f32
    %218 = vector.broadcast %cst_33 : f32 to vector<2x32xf32>
    %219 = arith.mulf %85, %218 : vector<2x32xf32>
    %c0_34 = arith.constant 0 : index
    %c0_35 = arith.constant 0 : index
    %220 = vector.load %arg9[%c0_34, %c0_35] : memref<32x32xf32, #tpu.memory_space<vmem>>, vector<32x32xf32>
    %cst_36 = arith.constant dense<0.000000e+00> : vector<2x32xf32>
    %221 = tpu.matmul %217, %220, %cst_36 {dimension_numbers = #tpu.dot_dimension_numbers<[1], [0], [0], [1], [0, 0, 1, 1], [], []>} : vector<2x32xf32>, vector<32x32xf32>, vector<2x32xf32> -> vector<2x32xf32>
    %222 = arith.addf %219, %221 : vector<2x32xf32>
    %c0_37 = arith.constant 0 : index
    %c0_38 = arith.constant 0 : index
    %223 = vector.load %arg10[%c0_37, %c0_38] : memref<1x32xf32, #tpu.memory_space<vmem>>, vector<1x32xf32>
    %224 = vector.broadcast %223 : vector<1x32xf32> to vector<2x32xf32>
    %225 = arith.addf %222, %224 : vector<2x32xf32>
    %226 = arith.negf %225 : vector<2x32xf32>
    %227 = math.exp %226 : vector<2x32xf32>
    %cst_39 = arith.constant 1.000000e+00 : f32
    %228 = vector.broadcast %cst_39 : f32 to vector<2x32xf32>
    %229 = arith.addf %228, %227 : vector<2x32xf32>
    %230 = arith.divf %228, %229 : vector<2x32xf32>
    %231 = arith.mulf %230, %217 : vector<2x32xf32>
    %c0_40 = arith.constant 0 : index
    %c0_41 = arith.constant 0 : index
    %232 = vector.load %arg11[%c0_40, %c0_41] : memref<32x8xf32, #tpu.memory_space<vmem>>, vector<32x8xf32>
    %cst_42 = arith.constant dense<0.000000e+00> : vector<2x8xf32>
    %233 = tpu.matmul %231, %232, %cst_42 {dimension_numbers = #tpu.dot_dimension_numbers<[1], [0], [0], [1], [0, 0, 1, 1], [], []>} : vector<2x32xf32>, vector<32x8xf32>, vector<2x8xf32> -> vector<2x8xf32>
    %c0_43 = arith.constant 0 : index
    %c0_44 = arith.constant 0 : index
    %234 = vector.load %arg12[%c0_43, %c0_44] : memref<1x8xf32, #tpu.memory_space<vmem>>, vector<1x8xf32>
    %235 = vector.broadcast %234 : vector<1x8xf32> to vector<2x8xf32>
    %236 = arith.addf %233, %235 : vector<2x8xf32>
    %c0_45 = arith.constant 0 : index
    %c0_46 = arith.constant 0 : index
    %237 = vector.load %arg13[%c0_45, %c0_46] : memref<2x8xf32, #tpu.memory_space<vmem>>, vector<2x8xf32>
    tpu.vector_store %arg13[%c0_45, %c0_46], %236 {strides = array<i32>} : memref<2x8xf32, #tpu.memory_space<vmem>>, vector<2x8xf32>,
    return
  }
  func.func @transform_0(%arg0: i32) -> (i32, i32) {
    %c0_i32 = arith.constant 0 : i32
    %c0_i32_0 = arith.constant 0 : i32
    %c0_i32_1 = arith.constant 0 : i32
    return %c0_i32, %c0_i32_0 : i32, i32
  }
  func.func @transform_1(%arg0: i32) -> (i32, i32) {
    %c0_i32 = arith.constant 0 : i32
    %c0_i32_0 = arith.constant 0 : i32
    %c0_i32_1 = arith.constant 0 : i32
    return %c0_i32, %c0_i32_0 : i32, i32
  }
  func.func @transform_2(%arg0: i32) -> (i32, i32) {
    %c0_i32 = arith.constant 0 : i32
    %c0_i32_0 = arith.constant 0 : i32
    %c0_i32_1 = arith.constant 0 : i32
    return %c0_i32, %c0_i32_0 : i32, i32
  }
  func.func @transform_3(%arg0: i32) -> (i32, i32) {
    %c0_i32 = arith.constant 0 : i32
    %c0_i32_0 = arith.constant 0 : i32
    %c0_i32_1 = arith.constant 0 : i32
    return %c0_i32, %c0_i32_0 : i32, i32
  }
  func.func @transform_4(%arg0: i32) -> (i32, i32) {
    %c0_i32 = arith.constant 0 : i32
    %c0_i32_0 = arith.constant 0 : i32
    %c0_i32_1 = arith.constant 0 : i32
    return %c0_i32, %c0_i32_0 : i32, i32
  }
  func.func @transform_5(%arg0: i32) -> (i32, i32) {
    %c0_i32 = arith.constant 0 : i32
    %c0_i32_0 = arith.constant 0 : i32
    %c0_i32_1 = arith.constant 0 : i32
    return %c0_i32, %c0_i32_0 : i32, i32
  }
  func.func @transform_6(%arg0: i32) -> (i32, i32) {
    %c0_i32 = arith.constant 0 : i32
    %c0_i32_0 = arith.constant 0 : i32
    %c0_i32_1 = arith.constant 0 : i32
    return %c0_i32, %c0_i32_0 : i32, i32
  }
  func.func @transform_7(%arg0: i32) -> (i32, i32) {
    %c0_i32 = arith.constant 0 : i32
    %c0_i32_0 = arith.constant 0 : i32
    %c0_i32_1 = arith.constant 0 : i32
    return %c0_i32, %c0_i32_0 : i32, i32
  }
  func.func @transform_8(%arg0: i32) -> (i32, i32) {
    %c0_i32 = arith.constant 0 : i32
    %c0_i32_0 = arith.constant 0 : i32
    %c0_i32_1 = arith.constant 0 : i32
    return %c0_i32, %c0_i32_0 : i32, i32
  }
  func.func @transform_9(%arg0: i32) -> (i32, i32) {
    %c0_i32 = arith.constant 0 : i32
    %c0_i32_0 = arith.constant 0 : i32
    %c0_i32_1 = arith.constant 0 : i32
    return %c0_i32, %c0_i32_0 : i32, i32
  }
  func.func @transform_10(%arg0: i32) -> (i32, i32) {
    %c0_i32 = arith.constant 0 : i32
    %c0_i32_0 = arith.constant 0 : i32
    %c0_i32_1 = arith.constant 0 : i32
    return %c0_i32, %c0_i32_0 : i32, i32
  }
  func.func @transform_11(%arg0: i32) -> (i32, i32) {
    %c0_i32 = arith.constant 0 : i32
    %c0_i32_0 = arith.constant 0 : i32
    %c0_i32_1 = arith.constant 0 : i32
    return %c0_i32, %c0_i32_0 : i32, i32
  }
  func.func @transform_12(%arg0: i32) -> (i32, i32) {
    %c0_i32 = arith.constant 0 : i32
    %c0_i32_0 = arith.constant 0 : i32
    %c0_i32_1 = arith.constant 0 : i32
    return %c0_i32, %c0_i32_0 : i32, i32
  }
}

</mosaic_0001>

<bundles_post_ra>
// kernel: holistic_reader_forward.1
= control target key start
LH: loop header
LB: loop body
LE: loop exit
PB: predicated region body
PF: predicated region fallthrough
CT: control target
= control target key end

     0   :  { %v2477_v1 = vmov 2   ;;  %v2478_v2 = vmov 0   ;;  %v2479_v10 = vmov 3   ;;  %v2480_v11 = vmov 1   ;;  %s3263_s0 = inlined_call_operand.vmem [shape: s32[12,4], index: 0, kind: input, shape index: {}]   ;;  %s3264_s1 = inlined_call_operand.vmem [shape: bf16[512,160], index: 1, kind: input, shape index: {}]   ;;  %s3265_s2 = inlined_call_operand.vmem [shape: bf16[512,160], index: 2, kind: input, shape index: {}]   ;;  %s3266_s3 = inlined_call_operand.vmem [shape: f32[1,160], index: 3, kind: input, shape index: {}]   ;;  %s3267_s4 = inlined_call_operand.vmem [shape: f32[1,160], index: 4, kind: input, shape index: {}]   ;;  %s3268_s5 = inlined_call_operand.vmem [shape: f32[2,32], index: 5, kind: input, shape index: {}]   ;;  %s3269_s6 = inlined_call_operand.vmem [shape: f32[2,32], index: 6, kind: input, shape index: {}]   ;;  %s3270_s7 = inlined_call_operand.vmem [shape: bf16[32,128], index: 7, kind: input, shape index: {}]   ;;  %s3271_s8 = inlined_call_operand.vmem [shape: f32[32,32], index: 8, kind: input, shape index: {}]   ;;  %s3272_s9 = inlined_call_operand.vmem [shape: f32[1,32], index: 9, kind: input, shape index: {}]   ;;  %s3273_s10 = inlined_call_operand.vmem [shape: f32[32,8], index: 10, kind: input, shape index: {}]   ;;  %s3274_s11 = inlined_call_operand.vmem [shape: f32[1,8], index: 11, kind: input, shape index: {}]   ;;  %s3275_s12 = inlined_call_operand.hbm [shape: f32[2,8], index: 12, kind: output, shape index: {}]  }
   0x1   :  { %v43_v0 = vld [vmem:[%s3263_s0] sm:$0xff]  ;;  %2204 = vset.pattern.permute.xlu1 %v2477_v1  ;;  %2202 = vset.pattern.permute.xlu0 %v2478_v2  ;;  %v2209_v3 = vld [vmem:[%s3264_s1 + $0x74] ss:$8 sps:$4 sm:$0xff]   ;;  %v2213_v5 = vld [vmem:[%s3264_s1 + $0x70] ss:$8 sps:$4 sm:$0xff]  }
   0x2   :  { %97 = vperm.xlu1 %2204, %v43_v0   ;;  %51 = vperm.xlu0 %2202, %v43_v0   ;;  %v2211_v4 = vld [vmem:[%s3264_s1 + $0x174] ss:$8 sps:$4 sm:$0xff]   ;;  %v2214_v6 = vld [vmem:[%s3264_s1 + $0x170] ss:$8 sps:$4 sm:$0xff]   ;;  %v2215_v7 = vld [vmem:[%s3264_s1 + $0x64] ss:$8 sps:$4 sm:$0xff]  }
   0x3   :  { %538 = vmatprep.subr.bf16.mxu0 %v2209_v3  ;;  %579 = vmatprep.subr.bf16.mxu1 %v2211_v4  ;;  %v2217_v8 = vld [vmem:[%s3264_s1 + $0x164] ss:$8 sps:$4 sm:$0xff]   ;;  %v2219_v9 = vld [vmem:[%s3264_s1 + $0x60] ss:$8 sps:$4 sm:$0xff]   ;;  %v2221_v14 = vld [vmem:[%s3264_s1 + $0x54] ss:$8 sps:$4 sm:$0xff]  }
   0x4   :  { %539 = vmatpush1.bf16.msra.mxu0 %v2213_v5  ;;  %580 = vmatpush1.bf16.msra.mxu1 %v2214_v6  ;;  %v44_v12 = vld [vmem:[%s3263_s0 + $0x8] sm:$0xf]  ;;  %v2223_v15 = vld [vmem:[%s3264_s1 + $0x154] ss:$8 sps:$4 sm:$0xff]   ;;  %v2225_v16 = vld [vmem:[%s3264_s1 + $0x50] ss:$8 sps:$4 sm:$0xff]  }
   0x5   :  { %v2220_v13 = vld [vmem:[%s3264_s1 + $0x160] ss:$8 sps:$4 sm:$0xff]   ;;  %540 = vmatprep.subr.bf16.mxu0 %v2215_v7  ;;  %581 = vmatprep.subr.bf16.mxu1 %v2217_v8  ;;  %v2226_v17 = vld [vmem:[%s3264_s1 + $0x150] ss:$8 sps:$4 sm:$0xff]   ;;  %v2227_v18 = vld [vmem:[%s3264_s1 + $0x44] ss:$8 sps:$4 sm:$0xff]  }
   0x6   :  { %2205 = vset.pattern.permute.xlu1 %v2479_v10  ;;  %2203 = vset.pattern.permute.xlu0 %v2480_v11  ;;  %v2229_v19 = vld [vmem:[%s3264_s1 + $0x144] ss:$8 sps:$4 sm:$0xff]   ;;  %v2231_v20 = vld [vmem:[%s3264_s1 + $0x40] ss:$8 sps:$4 sm:$0xff]   ;;  %v2233_v22 = vld [vmem:[%s3264_s1 + $0x34] ss:$8 sps:$4 sm:$0xff]  }
   0x7   :  { %120 = vperm.xlu1 %2205, %v43_v0   ;;  %74 = vperm.xlu0 %2203, %v43_v0   ;;  %v2232_v21 = vld [vmem:[%s3264_s1 + $0x140] ss:$8 sps:$4 sm:$0xff]   ;;  %v2235_v23 = vld [vmem:[%s3264_s1 + $0x134] ss:$8 sps:$4 sm:$0xff]   ;;  %v2237_v24 = vld [vmem:[%s3264_s1 + $0x30] ss:$8 sps:$4 sm:$0xff]  }
   0x8   :  { %541 = vmatpush1.bf16.msra.mxu0 %v2219_v9  ;;  %582 = vmatpush1.bf16.msra.mxu1 %v2220_v13  ;;  %v2238_v25 = vld [vmem:[%s3264_s1 + $0x130] ss:$8 sps:$4 sm:$0xff]   ;;  %v2239_v26 = vld [vmem:[%s3264_s1 + $0x24] ss:$8 sps:$4 sm:$0xff]   ;;  %v2243_v28 = vld [vmem:[%s3264_s1 + $0x20] ss:$8 sps:$4 sm:$0xff]  }
   0x9   :  { %542 = vmatprep.subr.bf16.mxu0 %v2221_v14  ;;  %583 = vmatprep.subr.bf16.mxu1 %v2223_v15  ;;  %v2241_v27 = vld [vmem:[%s3264_s1 + $0x124] ss:$8 sps:$4 sm:$0xff]   ;;  %v2244_v29 = vld [vmem:[%s3264_s1 + $0x120] ss:$8 sps:$4 sm:$0xff]   ;;  %v2245_v30 = vld [vmem:[%s3264_s1 + $0x14] ss:$8 sps:$4 sm:$0xff]  }
   0xa   :  { %v2247_v31 = vld [vmem:[%s3264_s1 + $0x114] ss:$8 sps:$4 sm:$0xff]   ;;  %v2249_v32 = vld [vmem:[%s3264_s1 + $0x10] ss:$8 sps:$4 sm:$0xff]   ;;  %v2251_v34 = vld [vmem:[%s3264_s1 + $0x4] ss:$8 sps:$4 sm:$0xff]  }
   0xb   :  { %2206 = vset.pattern.permute.xlu1 %v2478_v2  ;;  %644 = vperm.xlu0 %2203, %v44_v12   ;;  %v2250_v33 = vld [vmem:[%s3264_s1 + $0x110] ss:$8 sps:$4 sm:$0xff]   ;;  %v2253_v35 = vld [vmem:[%s3264_s1 + $0x104] ss:$8 sps:$4 sm:$0xff]   ;;  %v2255_v36 = vld [vmem:[%s3264_s1] ss:$8 sps:$4 sm:$0xff]  }
   0xc   :  { %621 = vperm.xlu1 %2206, %v44_v12   ;;  %543 = vmatpush1.bf16.msra.mxu0 %v2225_v16  ;;  %v2256_v37 = vld [vmem:[%s3264_s1 + $0x100] ss:$8 sps:$4 sm:$0xff]   ;;  %v2257_v38 = vld [vmem:[%s3264_s1 + $0xf4] ss:$8 sps:$4 sm:$0xff]   ;;  %v2261_v40 = vld [vmem:[%s3264_s1 + $0xf0] ss:$8 sps:$4 sm:$0xff]  }
   0xd   :  { %584 = vmatpush1.bf16.msra.mxu1 %v2226_v17  ;;  %544 = vmatprep.subr.bf16.mxu0 %v2227_v18  ;;  %v2259_v39 = vld [vmem:[%s3264_s1 + $0x1f4] ss:$8 sps:$4 sm:$0xff]   ;;  %v2262_v41 = vld [vmem:[%s3264_s1 + $0x1f0] ss:$8 sps:$4 sm:$0xff]   ;;  %v2263_v42 = vld [vmem:[%s3264_s1 + $0xe4] ss:$8 sps:$4 sm:$0xff]  }
   0xe   :  { %585 = vmatprep.subr.bf16.mxu1 %v2229_v19  ;;  %v2265_v43 = vld [vmem:[%s3264_s1 + $0x1e4] ss:$8 sps:$4 sm:$0xff]   ;;  %v2267_v44 = vld [vmem:[%s3264_s1 + $0xe0] ss:$8 sps:$4 sm:$0xff]   ;;  %v2269_v46 = vld [vmem:[%s3264_s1 + $0xd4] ss:$8 sps:$4 sm:$0xff]  }
   0xf   :  { %2208 = vset.pattern.permute.xlu0 %v2479_v10  ;;  %v2268_v45 = vld [vmem:[%s3264_s1 + $0x1e0] ss:$8 sps:$4 sm:$0xff]   ;;  %v2271_v47 = vld [vmem:[%s3264_s1 + $0x1d4] ss:$8 sps:$4 sm:$0xff]   ;;  %v2273_v48 = vld [vmem:[%s3264_s1 + $0xd0] ss:$8 sps:$4 sm:$0xff]  }
  0x10   :  { %2207 = vset.pattern.permute.xlu1 %v2477_v1  ;;  %690 = vperm.xlu0 %2208, %v44_v12   ;;  %v2274_v49 = vld [vmem:[%s3264_s1 + $0x1d0] ss:$8 sps:$4 sm:$0xff]   ;;  %v2275_v50 = vld [vmem:[%s3264_s1 + $0xc4] ss:$8 sps:$4 sm:$0xff]   ;;  %v2279_v52 = vld [vmem:[%s3264_s1 + $0xc0] ss:$8 sps:$4 sm:$0xff]  }
  0x11   :  { %667 = vperm.xlu1 %2207, %v44_v12   ;;  %545 = vmatpush1.bf16.msra.mxu0 %v2231_v20  ;;  %v2277_v51 = vld [vmem:[%s3264_s1 + $0x1c4] ss:$8 sps:$4 sm:$0xff]   ;;  %v2280_v53 = vld [vmem:[%s3264_s1 + $0x1c0] ss:$8 sps:$4 sm:$0xff]   ;;  %v2281_v54 = vld [vmem:[%s3264_s1 + $0xb4] ss:$8 sps:$4 sm:$0xff]  }
  0x12   :  { %586 = vmatpush1.bf16.msra.mxu1 %v2232_v21  ;;  %546 = vmatprep.subr.bf16.mxu0 %v2233_v22  ;;  %v2283_v55 = vld [vmem:[%s3264_s1 + $0x1b4] ss:$8 sps:$4 sm:$0xff]   ;;  %v2285_v56 = vld [vmem:[%s3264_s1 + $0xb0] ss:$8 sps:$4 sm:$0xff]   ;;  %v2287_v58 = vld [vmem:[%s3264_s1 + $0xa4] ss:$8 sps:$4 sm:$0xff]  }
  0x13   :  { %587 = vmatprep.subr.bf16.mxu1 %v2235_v23  ;;  %v2286_v57 = vld [vmem:[%s3264_s1 + $0x1b0] ss:$8 sps:$4 sm:$0xff]   ;;  %v2289_v59 = vld [vmem:[%s3264_s1 + $0x1a4] ss:$8 sps:$4 sm:$0xff]   ;;  %v2291_v60 = vld [vmem:[%s3264_s1 + $0xa0] ss:$8 sps:$4 sm:$0xff]  }
  0x14   :  { %v2292_v61 = vld [vmem:[%s3264_s1 + $0x1a0] ss:$8 sps:$4 sm:$0xff]   ;;  %v2293_v62 = vld [vmem:[%s3264_s1 + $0x94] ss:$8 sps:$4 sm:$0xff]   ;;  %v2297_v0 = vld [vmem:[%s3264_s1 + $0x90] ss:$8 sps:$4 sm:$0xff]  }
  0x15   :  { %547 = vmatpush1.bf16.msra.mxu0 %v2237_v24  ;;  %v2295_v63 = vld [vmem:[%s3264_s1 + $0x194] ss:$8 sps:$4 sm:$0xff]   ;;  %v2298_v1 = vld [vmem:[%s3264_s1 + $0x190] ss:$8 sps:$4 sm:$0xff]   ;;  %v2299_v2 = vld [vmem:[%s3264_s1 + $0x84] ss:$8 sps:$4 sm:$0xff]  }
  0x16   :  { %588 = vmatpush1.bf16.msra.mxu1 %v2238_v25  ;;  %548 = vmatprep.subr.bf16.mxu0 %v2239_v26  ;;  %v2301_v3 = vld [vmem:[%s3264_s1 + $0x184] ss:$8 sps:$4 sm:$0xff]   ;;  %v2303_v4 = vld [vmem:[%s3264_s1 + $0x80] ss:$8 sps:$4 sm:$0xff]   ;;  %v2307_v6 = vld [vmem:[%s3265_s2 + $0x74] ss:$8 sps:$4 sm:$0xff]  }
  0x17   :  { %589 = vmatprep.subr.bf16.mxu1 %v2241_v27  ;;  %v2304_v5 = vld [vmem:[%s3264_s1 + $0x180] ss:$8 sps:$4 sm:$0xff]   ;;  %v2310_v7 = vld [vmem:[%s3265_s2 + $0x174] ss:$8 sps:$4 sm:$0xff]  }
  0x19   :  { %549 = vmatpush1.bf16.msra.mxu0 %v2243_v28 }
  0x1a   :  { %590 = vmatpush1.bf16.msra.mxu1 %v2244_v29  ;;  %550 = vmatprep.subr.bf16.mxu0 %v2245_v30 }
  0x1b   :  { %591 = vmatprep.subr.bf16.mxu1 %v2247_v31 }
  0x1d   :  { %551 = vmatpush1.bf16.msra.mxu0 %v2249_v32 }
  0x1e   :  { %592 = vmatpush1.bf16.msra.mxu1 %v2250_v33  ;;  %552 = vmatprep.subr.bf16.mxu0 %v2251_v34 }
  0x1f   :  { %593 = vmatprep.subr.bf16.mxu1 %v2253_v35 }
  0x21   :  { %553 = vmatpush1.bf16.msra.mxu0 %v2255_v36 }
  0x22   :  { %594 = vmatpush1.bf16.msra.mxu1 %v2256_v37  ;;  %554 = vmatprep.subr.bf16.mxu0 %v2257_v38 }
  0x23   :  { %595 = vmatprep.subr.bf16.mxu1 %v2259_v39 }
  0x25   :  { %555 = vmatpush2.bf16.msra.mxu0 %v2261_v40 }
  0x26   :  { %596 = vmatpush2.bf16.msra.mxu1 %v2262_v41  ;;  %556 = vmatprep.subr.bf16.mxu0 %v2263_v42 }
  0x27   :  { %597 = vmatprep.subr.bf16.mxu1 %v2265_v43 }
  0x29   :  { %557 = vmatpush2.bf16.msra.mxu0 %v2267_v44 }
  0x2a   :  { %598 = vmatpush2.bf16.msra.mxu1 %v2268_v45  ;;  %558 = vmatprep.subr.bf16.mxu0 %v2269_v46 }
  0x2b   :  { %599 = vmatprep.subr.bf16.mxu1 %v2271_v47 }
  0x2d   :  { %559 = vmatpush2.bf16.msra.mxu0 %v2273_v48 }
  0x2e   :  { %600 = vmatpush2.bf16.msra.mxu1 %v2274_v49  ;;  %560 = vmatprep.subr.bf16.mxu0 %v2275_v50 }
  0x2f   :  { %601 = vmatprep.subr.bf16.mxu1 %v2277_v51 }
  0x31   :  { %561 = vmatpush2.bf16.msra.mxu0 %v2279_v52 }
  0x32   :  { %602 = vmatpush2.bf16.msra.mxu1 %v2280_v53  ;;  %562 = vmatprep.subr.bf16.mxu0 %v2281_v54 }
  0x33   :  { %603 = vmatprep.subr.bf16.mxu1 %v2283_v55 }
  0x35   :  { %563 = vmatpush2.bf16.msra.mxu0 %v2285_v56 }
  0x36   :  { %604 = vmatpush2.bf16.msra.mxu1 %v2286_v57  ;;  %564 = vmatprep.subr.bf16.mxu0 %v2287_v58 }
  0x37   :  { %605 = vmatprep.subr.bf16.mxu1 %v2289_v59 }
  0x39   :  { %565 = vmatpush2.bf16.msra.mxu0 %v2291_v60 }
  0x3a   :  { %606 = vmatpush2.bf16.msra.mxu1 %v2292_v61  ;;  %566 = vmatprep.subr.bf16.mxu0 %v2293_v62 }
  0x3b   :  { %607 = vmatprep.subr.bf16.mxu1 %v2295_v63 }
  0x3d   :  { %567 = vmatpush2.bf16.msra.mxu0 %v2297_v0 }
  0x3e   :  { %608 = vmatpush2.bf16.msra.mxu1 %v2298_v1  ;;  %568 = vmatprep.subr.bf16.mxu0 %v2299_v2 }
  0x3f   :  { %609 = vmatprep.subr.bf16.mxu1 %v2301_v3 }
  0x41   :  { %569 = vmatpush2.bf16.msra.mxu0 %v2303_v4 }
  0x42   :  { %610 = vmatpush2.bf16.msra.mxu1 %v2304_v5  ;;  %1120 = vmatprep.subr.bf16.mxu0 %v2307_v6 }
  0x43   :  { %1161 = vmatprep.subr.bf16.mxu1 %v2310_v7 }
  0x44   :  { %17 = vsyncpa [#allocation3], 0  ;;  %v45_v8 = vlaneseq  ;;  %v2481_v17 = vmov 0.0  }
  0x46   :  { %v2756_v9 = vand.u32 127, %v45_v8 }
  0x48   :  { %v2759_v10 = vadd.s32 256, %v2756_v9  ;;  %v2764_v13 = vadd.s32 128, %v2756_v9  ;;  %v2769_v14 = vadd.s32 384, %v2756_v9 }
  0x7d   :  { %v52_v11 = vpop.permute.xlu0 %51  ;;  %v2761_v12 = vpop.permute.xlu1 %97 }
  0x7e   :  { %vm53_vm0 = vcmp.eq.s32.totalorder %v52_v11, %v2756_v9  ;;  %vm55_vm1 = vcmp.eq.s32.totalorder %v52_v11, %v2759_v10  ;;  %vm54_vm2 = vcmp.eq.s32.totalorder %v52_v11, %v2764_v13  ;;  %vm56_vm3 = vcmp.eq.s32.totalorder %v52_v11, %v2769_v14 }
  0x7f   :  { %v2775_v18 = vsel %vm53_vm0, 1.0, %v2481_v17  ;;  %v2778_v19 = vsel %vm55_vm1, 1.0, %v2481_v17  ;;  %vm99_vm4 = vcmp.eq.s32.totalorder %v2761_v12, %v2756_v9  ;;  %v1917_v20 = vsel %vm54_vm2, 1.0, %v2481_v17 }
  0x80   :  { %v65_v21 = vpack.c.bf16 %v2775_v18, %v2775_v18  ;;  %v67_v22 = vpack.c.bf16 %v2778_v19, %v2778_v19  ;;  %vm101_vm5 = vcmp.eq.s32.totalorder %v2761_v12, %v2759_v10  ;;  %v1919_v24 = vsel %vm56_vm3, 1.0, %v2481_v17 }
  0x81   :  { %vm100_vm6 = vcmp.eq.s32.totalorder %v2761_v12, %v2764_v13  ;;  %v2796_v25 = vsel %vm99_vm4, 1.0, %v2481_v17  ;;  %v66_v27 = vpack.c.bf16 %v1917_v20, %v1917_v20  ;;  %vm102_vm11 = vcmp.eq.s32.totalorder %v2761_v12, %v2769_v14 }
  0x82   :  { %v2771_v15 = vpop.permute.xlu1 %120  ;;  %v75_v16 = vpop.permute.xlu0 %74  ;;  %v69_v28 = vadd.bf16 0, %v65_v21  ;;  %v2805_v29 = vadd.bf16 0, %v67_v22  ;;  %v2810_v30 = vsel %vm101_vm5, 1.0, %v2481_v17  ;;  %v111_v35 = vpack.c.bf16 %v2796_v25, %v2796_v25 }
  0x83   :  { %vm77_vm7 = vcmp.eq.s32.totalorder %v75_v16, %v2764_v13  ;;  %vm76_vm8 = vcmp.eq.s32.totalorder %v75_v16, %v2756_v9  ;;  %vm78_vm9 = vcmp.eq.s32.totalorder %v75_v16, %v2759_v10  ;;  %vm79_vm13 = vcmp.eq.s32.totalorder %v75_v16, %v2769_v14 }
  0x84   :  { %v1921_v31 = vsel %vm77_vm7, 1.0, %v2481_v17  ;;  %v2821_v32 = vsel %vm76_vm8, 1.0, %v2481_v17  ;;  %v2824_v33 = vsel %vm78_vm9, 1.0, %v2481_v17  ;;  %vm122_vm0 = vcmp.eq.s32.totalorder %v2771_v15, %v2756_v9 }
  0x85   :  { %v113_v36 = vpack.c.bf16 %v2810_v30, %v2810_v30  ;;  %vm124_vm1 = vcmp.eq.s32.totalorder %v2771_v15, %v2759_v10  ;;  %v1923_v39 = vsel %vm79_vm13, 1.0, %v2481_v17  ;;  %v89_v43 = vpack.c.bf16 %v1921_v31, %v1921_v31 }
  0x86   :  { %v2799_v26 = vpop.permute.xlu0 %644  ;;  %v88_v44 = vpack.c.bf16 %v2821_v32, %v2821_v32  ;;  %v90_v45 = vpack.c.bf16 %v2824_v33, %v2824_v33  ;;  %v2848_v46 = vsel %vm122_vm0, 1.0, %v2481_v17  ;;  %v2851_v48 = vsel %vm124_vm1, 1.0, %v2481_v17 }
  0x87   :  { %v2788_v23 = vpop.permute.xlu1 %621  ;;  %vm647_vm14 = vcmp.eq.s32.totalorder %v2799_v26, %v2764_v13  ;;  %vm649_vm15 = vcmp.eq.s32.totalorder %v2799_v26, %v2769_v14  ;;  %v70_v50 = vadd.bf16 0, %v66_v27  ;;  %v1925_v55 = vsel %vm100_vm6, 1.0, %v2481_v17 }
  0x88   :  { %vm624_vm10 = vcmp.eq.s32.totalorder %v2788_v23, %v2764_v13  ;;  %vm626_vm12 = vcmp.eq.s32.totalorder %v2788_v23, %v2769_v14  ;;  %v2001_v40 = vsel %vm647_vm14, 1.0, %v2481_v17  ;;  %v2003_v41 = vsel %vm649_vm15, 1.0, %v2481_v17 }
  0x89   :  { %v1997_v34 = vsel %vm624_vm10, 1.0, %v2481_v17  ;;  %v1999_v37 = vsel %vm626_vm12, 1.0, %v2481_v17  ;;  %v659_v51 = vpack.c.bf16 %v2001_v40, %v1921_v31  ;;  %v661_v52 = vpack.c.bf16 %v2003_v41, %v1923_v39  ;;  %v2313_v40 = vld [vmem:[%s3265_s2 + $0x64] ss:$8 sps:$4 sm:$0xff]  }
  0x8a   :  { %v636_v47 = vpack.c.bf16 %v1997_v34, %v1917_v20  ;;  %v638_v49 = vpack.c.bf16 %v1999_v37, %v1919_v24  ;;  %v93_v54 = vadd.bf16 %v89_v43, %v70_v50  ;;  %vm123_vm5 = vcmp.eq.s32.totalorder %v2771_v15, %v2764_v13  ;;  %v2308_v43 = vld [vmem:[%s3265_s2 + $0x170] ss:$8 sps:$4 sm:$0xff]  }
  0x8b   :  { %v2841_v42 = vpop.permute.xlu0 %690  ;;  %v112_v57 = vpack.c.bf16 %v1925_v55, %v1925_v55  ;;  %v1929_v58 = vsel %vm123_vm5, 1.0, %v2481_v17  ;;  %v68_v62 = vpack.c.bf16 %v1919_v24, %v1919_v24  ;;  %v91_v1 = vpack.c.bf16 %v1923_v39, %v1923_v39 }
  0x8c   :  { %v2836_v38 = vpop.permute.xlu1 %667  ;;  %vm693_vm3 = vcmp.eq.s32.totalorder %v2841_v42, %v2764_v13  ;;  %v640_v56 = vadd.bf16 0, %v636_v47  ;;  %vm695_vm7 = vcmp.eq.s32.totalorder %v2841_v42, %v2769_v14  ;;  %v642_v59 = vadd.bf16 0, %v638_v49  ;;  %v2316_v47 = vld [vmem:[%s3265_s2 + $0x164] ss:$8 sps:$4 sm:$0xff]  }
  0x8d   :  { %vm670_vm2 = vcmp.eq.s32.totalorder %v2836_v38, %v2764_v13  ;;  %vm672_vm4 = vcmp.eq.s32.totalorder %v2836_v38, %v2769_v14  ;;  %v135_v61 = vpack.c.bf16 %v1929_v58, %v1929_v58  ;;  %v116_v63 = vadd.bf16 %v112_v57, %v93_v54  ;;  %v2325_v57 = vld [vmem:[%s3265_s2 + $0x44] ss:$8 sps:$4 sm:$0xff]  }
  0x8e   :  { %v2005_v53 = vsel %vm670_vm2, 1.0, %v2481_v17  ;;  %v2007_v60 = vsel %vm672_vm4, 1.0, %v2481_v17  ;;  %v1927_v2 = vsel %vm102_vm11, 1.0, %v2481_v17  ;;  %v2009_v3 = vsel %vm693_vm3, 1.0, %v2481_v17 }
  0x8f   :  { %v682_v0 = vpack.c.bf16 %v2005_v53, %v1925_v55  ;;  %v72_v4 = vadd.bf16 0, %v68_v62  ;;  %v114_v5 = vpack.c.bf16 %v1927_v2, %v1927_v2  ;;  %vm125_vm6 = vcmp.eq.s32.totalorder %v2771_v15, %v2769_v14  ;;  %v2314_v53 = vld [vmem:[%s3265_s2 + $0x160] ss:$8 sps:$4 sm:$0xff]   ;;  %v2322_v55 = vld [vmem:[%s3265_s2 + $0x154] ss:$8 sps:$4 sm:$0xff]  }
  0x90   :  { %v139_v6 = vadd.bf16 %v135_v61, %v116_v63  ;;  %v1931_v7 = vsel %vm125_vm6, 1.0, %v2481_v17  ;;  %v684_v11 = vpack.c.bf16 %v2007_v60, %v1927_v2  ;;  %v92_v16 = vadd.bf16 %v88_v44, %v69_v28  ;;  %v2305_v28 = vld [vmem:[%s3265_s2 + $0x70] ss:$8 sps:$4 sm:$0xff]   ;;  %v2323_v60 = vld [vmem:[%s3265_s2 + $0x40] ss:$8 sps:$4 sm:$0xff]  }
  0x91   :  { %v95_v20 = vadd.bf16 %v91_v1, %v72_v4  ;;  %v137_v21 = vpack.c.bf16 %v1931_v7, %v1931_v7  ;;  %v2011_v12 = vsel %vm695_vm7, 1.0, %v2481_v17  ;;  %v134_v13 = vpack.c.bf16 %v2848_v46, %v2848_v46  ;;  %v2331_v61 = vld [vmem:[%s3265_s2 + $0x34] ss:$8 sps:$4 sm:$0xff]   ;;  %v2326_v62 = vld [vmem:[%s3265_s2 + $0x140] ss:$8 sps:$4 sm:$0xff]  }
  0x92   :  { %570 = vmatprep.mubr.bf16.mxu0 %v139_v6  ;;  %v115_v22 = vadd.bf16 %v111_v35, %v92_v16  ;;  %v94_v24 = vadd.bf16 %v90_v45, %v2805_v29  ;;  %v136_v15 = vpack.c.bf16 %v2851_v48, %v2851_v48  ;;  %v663_v27 = vadd.bf16 %v659_v51, %v640_v56  ;;  %v2319_v51 = vld [vmem:[%s3265_s2 + $0x54] ss:$8 sps:$4 sm:$0xff]   ;;  %v2317_v56 = vld [vmem:[%s3265_s2 + $0x50] ss:$8 sps:$4 sm:$0xff]   ;;  %v2337_v1 = vld [vmem:[%s3265_s2 + $0x24] ss:$8 sps:$4 sm:$0xff]  }
  0x93   :  { %v118_v31 = vadd.bf16 %v114_v5, %v95_v20  ;;  %v665_v34 = vadd.bf16 %v661_v52, %v642_v59  ;;  %v705_v37 = vpack.c.bf16 %v2009_v3, %v1929_v58  ;;  %v707_v29 = vpack.c.bf16 %v2011_v12, %v1931_v7  ;;  %v2320_v58 = vld [vmem:[%s3265_s2 + $0x150] ss:$8 sps:$4 sm:$0xff]   ;;  %v2328_v59 = vld [vmem:[%s3265_s2 + $0x144] ss:$8 sps:$4 sm:$0xff]   ;;  %v2334_v63 = vld [vmem:[%s3265_s2 + $0x134] ss:$8 sps:$4 sm:$0xff]  }
  0x94   :  { %v138_v14 = vadd.bf16 %v134_v13, %v115_v22  ;;  %v117_v39 = vadd.bf16 %v113_v36, %v94_v24  ;;  %v686_v35 = vadd.bf16 %v682_v0, %v663_v27  ;;  %v2311_v36 = vld [vmem:[%s3265_s2 + $0x60] ss:$8 sps:$4 sm:$0xff]   ;;  %v2329_v0 = vld [vmem:[%s3265_s2 + $0x30] ss:$8 sps:$4 sm:$0xff]   ;;  %v2340_v3 = vld [vmem:[%s3265_s2 + $0x124] ss:$8 sps:$4 sm:$0xff]   ;;  %vm623_vm8 = vcmp.eq.s32.totalorder %v2788_v23, %v2756_v9 }
  0x95   :  { %v141_v41 = vadd.bf16 %v137_v21, %v118_v31  ;;  %v688_v44 = vadd.bf16 %v684_v11, %v665_v34  ;;  %v2332_v2 = vld [vmem:[%s3265_s2 + $0x130] ss:$8 sps:$4 sm:$0xff]   ;;  %v2335_v4 = vld [vmem:[%s3265_s2 + $0x20] ss:$8 sps:$4 sm:$0xff]   ;;  %v2343_v5 = vld [vmem:[%s3265_s2 + $0x14] ss:$8 sps:$4 sm:$0xff]   ;;  %vm625_vm9 = vcmp.eq.s32.totalorder %v2788_v23, %v2759_v10  ;;  %vm646_vm10 = vcmp.eq.s32.totalorder %v2799_v26, %v2756_v9 }
  0x96   :  { %571 = vmatmul.mubr.bf16.vlgmr.msra.gmra.mxu0 %v138_v14  ;;  %v140_v45 = vadd.bf16 %v136_v15, %v117_v39  ;;  %v709_v49 = vadd.bf16 %v705_v37, %v686_v35  ;;  %v2338_v6 = vld [vmem:[%s3265_s2 + $0x120] ss:$8 sps:$4 sm:$0xff]   ;;  %v2346_v7 = vld [vmem:[%s3265_s2 + $0x114] ss:$8 sps:$4 sm:$0xff]   ;;  %v2341_v11 = vld [vmem:[%s3265_s2 + $0x10] ss:$8 sps:$4 sm:$0xff]   ;;  %vm648_vm11 = vcmp.eq.s32.totalorder %v2799_v26, %v2759_v10  ;;  %vm669_vm12 = vcmp.eq.s32.totalorder %v2836_v38, %v2756_v9 }
  0x97   :  { %611 = vmatprep.mubr.bf16.mxu1 %v141_v41  ;;  %1121 = vmatpush1.bf16.msra.mxu0 %v2305_v28  ;;  %v711_v50 = vadd.bf16 %v707_v29, %v688_v44  ;;  %v2349_v16 = vld [vmem:[%s3265_s2 + $0x4] ss:$8 sps:$4 sm:$0xff]   ;;  %v2344_v20 = vld [vmem:[%s3265_s2 + $0x110] ss:$8 sps:$4 sm:$0xff]   ;;  %v2347_v12 = vld [vmem:[%s3265_s2] ss:$8 sps:$4 sm:$0xff]   ;;  %vm671_vm13 = vcmp.eq.s32.totalorder %v2836_v38, %v2759_v10  ;;  %vm692_vm14 = vcmp.eq.s32.totalorder %v2841_v42, %v2756_v9 }
  0x98   :  { %612 = vmatmul.mubr.bf16.vlgmr.msra.gmra.mxu1 %v140_v45  ;;  %1122 = vmatprep.subr.bf16.mxu0 %v2313_v40  ;;  %v793_v52 = vrot.slane %v709_v49, 2  ;;  %v2352_v21 = vld [vmem:[%s3265_s2 + $0x104] ss:$8 sps:$4 sm:$0xff]   ;;  %v2355_v13 = vld [vmem:[%s3265_s2 + $0xf4] ss:$8 sps:$4 sm:$0xff]   ;;  %v1996_v41 = vsel %vm623_vm8, 1.0, %v2481_v17  ;;  %vm694_vm15 = vcmp.eq.s32.totalorder %v2841_v42, %v2759_v10 }
  0x99   :  { %1162 = vmatpush1.bf16.msra.mxu1 %v2308_v43  ;;  %v795_v54 = vrot.slane %v711_v50, 2  ;;  %v2350_v22 = vld [vmem:[%s3265_s2 + $0x100] ss:$8 sps:$4 sm:$0xff]   ;;  %v2358_v24 = vld [vmem:[%s3265_s2 + $0x1f4] ss:$8 sps:$4 sm:$0xff]   ;;  %v1998_v44 = vsel %vm625_vm9, 1.0, %v2481_v17  ;;  %v635_v45 = vpack.c.bf16 %v1996_v41, %v2775_v18 }
  0x9a   :  { %1163 = vmatprep.subr.bf16.mxu1 %v2316_v47  ;;  %1152 = vmatprep.mubr.bf16.mxu0 %v793_v52  ;;  %v2353_v15 = vld [vmem:[%s3265_s2 + $0xf0] ss:$8 sps:$4 sm:$0xff]   ;;  %v2361_v27 = vld [vmem:[%s3265_s2 + $0xe4] ss:$8 sps:$4 sm:$0xff]   ;;  %v2359_v34 = vld [vmem:[%s3265_s2 + $0xe0] ss:$8 sps:$4 sm:$0xff]  }
  0x9b   :  { %1123 = vmatpush1.bf16.msra.mxu0 %v2311_v36  ;;  %1193 = vmatprep.mubr.bf16.mxu1 %v795_v54  ;;  %v2356_v31 = vld [vmem:[%s3265_s2 + $0x1f0] ss:$8 sps:$4 sm:$0xff]   ;;  %v2364_v28 = vld [vmem:[%s3265_s2 + $0x1e4] ss:$8 sps:$4 sm:$0xff]   ;;  %v2367_v37 = vld [vmem:[%s3265_s2 + $0xd4] ss:$8 sps:$4 sm:$0xff]   ;;  %v637_v36 = vpack.c.bf16 %v1998_v44, %v2778_v19 }
  0x9c   :  { %1124 = vmatprep.subr.bf16.mxu0 %v2319_v51  ;;  %v2362_v14 = vld [vmem:[%s3265_s2 + $0x1e0] ss:$8 sps:$4 sm:$0xff]   ;;  %v2370_v39 = vld [vmem:[%s3265_s2 + $0x1d4] ss:$8 sps:$4 sm:$0xff]   ;;  %v2365_v40 = vld [vmem:[%s3265_s2 + $0xd0] ss:$8 sps:$4 sm:$0xff]  }
  0x9d   :  { %1164 = vmatpush1.bf16.msra.mxu1 %v2314_v53  ;;  %v2373_v35 = vld [vmem:[%s3265_s2 + $0xc4] ss:$8 sps:$4 sm:$0xff]   ;;  %v2368_v29 = vld [vmem:[%s3265_s2 + $0x1d0] ss:$8 sps:$4 sm:$0xff]   ;;  %v2371_v23 = vld [vmem:[%s3265_s2 + $0xc0] ss:$8 sps:$4 sm:$0xff]  }
  0x9e   :  { %1165 = vmatprep.subr.bf16.mxu1 %v2322_v55  ;;  %v2376_v43 = vld [vmem:[%s3265_s2 + $0x1c4] ss:$8 sps:$4 sm:$0xff]   ;;  %v2379_v47 = vld [vmem:[%s3265_s2 + $0xb4] ss:$8 sps:$4 sm:$0xff]   ;;  %v2374_v49 = vld [vmem:[%s3265_s2 + $0x1c0] ss:$8 sps:$4 sm:$0xff]  }
  0x9f   :  { %1125 = vmatpush1.bf16.msra.mxu0 %v2317_v56  ;;  %v2382_v18 = vld [vmem:[%s3265_s2 + $0x1b4] ss:$8 sps:$4 sm:$0xff]   ;;  %v2000_v50 = vsel %vm646_vm10, 1.0, %v2481_v17  ;;  %v2377_v51 = vld [vmem:[%s3265_s2 + $0xb0] ss:$8 sps:$4 sm:$0xff]   ;;  %v639_v52 = vadd.bf16 0, %v635_v45 }
  0xa0   :  { %1126 = vmatprep.subr.bf16.mxu0 %v2325_v57  ;;  %v2385_v19 = vld [vmem:[%s3265_s2 + $0xa4] ss:$8 sps:$4 sm:$0xff]   ;;  %v2002_v26 = vsel %vm648_vm11, 1.0, %v2481_v17  ;;  %v2004_v53 = vsel %vm669_vm12, 1.0, %v2481_v17  ;;  %v2380_v54 = vld [vmem:[%s3265_s2 + $0x1b0] ss:$8 sps:$4 sm:$0xff]   ;;  %v658_v55 = vpack.c.bf16 %v2000_v50, %v2821_v32 }
  0xa1   :  { %1166 = vmatpush1.bf16.msra.mxu1 %v2320_v58  ;;  %v641_v56 = vadd.bf16 0, %v637_v36  ;;  %v2388_v38 = vld [vmem:[%s3265_s2 + $0x1a4] ss:$8 sps:$4 sm:$0xff]   ;;  %v2006_v57 = vsel %vm671_vm13, 1.0, %v2481_v17  ;;  %v2383_v58 = vld [vmem:[%s3265_s2 + $0xa0] ss:$8 sps:$4 sm:$0xff]   ;;  %v681_v32 = vpack.c.bf16 %v2004_v53, %v2796_v25 }
  0xa2   :  { %1167 = vmatprep.subr.bf16.mxu1 %v2328_v59  ;;  %v660_v59 = vpack.c.bf16 %v2002_v26, %v2824_v33  ;;  %v683_v33 = vpack.c.bf16 %v2006_v57, %v2810_v30  ;;  %v2394_v9 = vld [vmem:[%s3265_s2 + $0x194] ss:$8 sps:$4 sm:$0xff]   ;;  %v2008_v25 = vsel %vm692_vm14, 1.0, %v2481_v17  ;;  %v2397_v10 = vld [vmem:[%s3265_s2 + $0x84] ss:$8 sps:$4 sm:$0xff]   ;;  %v2010_v30 = vsel %vm694_vm15, 1.0, %v2481_v17 }
  0xa3   :  { %1127 = vmatpush1.bf16.msra.mxu0 %v2323_v60  ;;  %v662_v60 = vadd.bf16 %v658_v55, %v639_v52  ;;  %v2392_v42 = vld [vmem:[%s3265_s2 + $0x190] ss:$8 sps:$4 sm:$0xff]   ;;  %vm2482_vm0 = vmmov 0   ;;  %vm1237_vm1 = vcmask 261120   ;;  %v776_v45 = vld [vmem:[%s3267_s4] sm:$0x3] }
  0xa4   :  { %1128 = vmatprep.subr.bf16.mxu0 %v2331_v61  ;;  %v2391_v61 = vld [vmem:[%s3265_s2 + $0x94] ss:$8 sps:$4 sm:$0xff]   ;;  %vm1900_vm2 = vcmask 58368  }
  0xa5   :  { %1168 = vmatpush1.bf16.msra.mxu1 %v2326_v62  ;;  %v2386_v62 = vld [vmem:[%s3265_s2 + $0x1a0] ss:$8 sps:$4 sm:$0xff]  }
  0xa6   :  { %1169 = vmatprep.subr.bf16.mxu1 %v2334_v63  ;;  %v664_v63 = vadd.bf16 %v660_v59, %v641_v56 }
  0xa7   :  { %1129 = vmatpush1.bf16.msra.mxu0 %v2329_v0  ;;  %v2389_v0 = vld [vmem:[%s3265_s2 + $0x90] ss:$8 sps:$4 sm:$0xff]  }
  0xa8   :  { %1130 = vmatprep.subr.bf16.mxu0 %v2337_v1  ;;  %v685_v1 = vadd.bf16 %v681_v32, %v662_v60 }
  0xa9   :  { %1170 = vmatpush1.bf16.msra.mxu1 %v2332_v2  ;;  %v704_v2 = vpack.c.bf16 %v2008_v25, %v2848_v46  ;;  %v2398_v46 = vld [vmem:[%s3265_s2 + $0x180] ss:$8 sps:$4 sm:$0xff]  }
  0xaa   :  { %1171 = vmatprep.subr.bf16.mxu1 %v2340_v3  ;;  %v687_v3 = vadd.bf16 %v683_v33, %v664_v63 }
  0xab   :  { %1131 = vmatpush1.bf16.msra.mxu0 %v2335_v4  ;;  %v2400_v4 = vld [vmem:[%s3265_s2 + $0x184] ss:$8 sps:$4 sm:$0xff]  }
  0xac   :  { %1132 = vmatprep.subr.bf16.mxu0 %v2343_v5  ;;  %v2395_v5 = vld [vmem:[%s3265_s2 + $0x80] ss:$8 sps:$4 sm:$0xff]  }
  0xad   :  { %1172 = vmatpush1.bf16.msra.mxu1 %v2338_v6  ;;  %v706_v6 = vpack.c.bf16 %v2010_v30, %v2851_v48 }
  0xae   :  { %1173 = vmatprep.subr.bf16.mxu1 %v2346_v7  ;;  %v708_v7 = vadd.bf16 %v704_v2, %v685_v1 }
  0xaf   :  { %1133 = vmatpush1.bf16.msra.mxu0 %v2341_v11  ;;  %v710_v11 = vadd.bf16 %v706_v6, %v687_v3 }
  0xb0   :  { %1134 = vmatprep.subr.bf16.mxu0 %v2349_v16  ;;  %v3111_v16 = vld [vmem:[%s3270_s7 + $0x8] sm:$0xff]  }
  0xb1   :  { %1174 = vmatpush1.bf16.msra.mxu1 %v2344_v20  ;;  %v792_v20 = vrot.slane %v708_v7, 2  ;;  %v794_v48 = vrot.slane %v710_v11, 2 }
  0xb2   :  { %1175 = vmatprep.subr.bf16.mxu1 %v2352_v21  ;;  %v3119_v21 = vld [vmem:[%s3270_s7] sm:$0xff]  }
  0xb3   :  { %1135 = vmatpush1.bf16.msra.mxu0 %v2347_v12  ;;  %v1222_v12 = vld [vmem:[%s3268_s5] sm:$0x3]  ;;  %s2485_s5 = smov [#allocation2]  }
  0xb4   :  { %1136 = vmatprep.subr.bf16.mxu0 %v2355_v13  ;;  %v1224_v13 = vpack.c.bf16 %v1222_v12, %v1222_v12  ;;  %s1908_s7 = sshll.u32 %s2485_s5, 4  ;;  %s1909_s7 = int_to_ptr.vmem [resolvable:$true] %s1908_s7 }
  0xb5   :  { %1176 = vmatpush1.bf16.msra.mxu1 %v2350_v22  ;;  %v209_v22 = vshrl.u32 %v45_v8, 7  ;;  %p2460_p1 = scmp.lt.s32.totalorder %s1909_s7, %s1909_s7 }
  0xb6   :  { %1177 = vmatprep.subr.bf16.mxu1 %v2358_v24 }
  0xb7   :  { %1137 = vmatpush2.bf16.msra.mxu0 %v2353_v15  ;;  %v210_v24 = vsub.s32 0, %v209_v22  ;;  %v206_v15 = vld [vmem:[%s3266_s3] sm:$0x3]  ;;  %s2483_s3 = smov 32  }
  0xb8   :  { %1138 = vmatprep.subr.bf16.mxu0 %v2361_v27  ;;  %v214_v27 = vsub.s32 1, %v209_v22 }
  0xb9   :  { %1178 = vmatpush2.bf16.msra.mxu1 %v2356_v31  ;;  %v211_v31 = vrot.slane %v206_v15, %v210_v24 }
  0xba   :  { %1179 = vmatprep.subr.bf16.mxu1 %v2364_v28  ;;  %v215_v28 = vrot.slane %v206_v15, %v214_v27 }
  0xbb   :  { %1139 = vmatpush2.bf16.msra.mxu0 %v2359_v34 }
  0xbc   :  { %1140 = vmatprep.subr.bf16.mxu0 %v2367_v37 }
  0xbd   :  { %1180 = vmatpush2.bf16.msra.mxu1 %v2362_v14 }
  0xbe   :  { %1181 = vmatprep.subr.bf16.mxu1 %v2370_v39 }
  0xbf   :  { %1141 = vmatpush2.bf16.msra.mxu0 %v2365_v40 }
  0xc0   :  { %1142 = vmatprep.subr.bf16.mxu0 %v2373_v35 }
  0xc1   :  { %1182 = vmatpush2.bf16.msra.mxu1 %v2368_v29 }
  0xc2   :  { %1183 = vmatprep.subr.bf16.mxu1 %v2376_v43 }
  0xc3   :  { %1143 = vmatpush2.bf16.msra.mxu0 %v2371_v23 }
  0xc4   :  { %1144 = vmatprep.subr.bf16.mxu0 %v2379_v47  ;;  %v781_v47 = vrot.slane %v776_v45, %v210_v24 }
  0xc5   :  { %1184 = vmatpush2.bf16.msra.mxu1 %v2374_v49  ;;  %v785_v49 = vrot.slane %v776_v45, %v214_v27 }
  0xc6   :  { %1185 = vmatprep.subr.bf16.mxu1 %v2382_v18 }
  0xc7   :  { %1145 = vmatpush2.bf16.msra.mxu0 %v2377_v51 }
  0xc8   :  { %1146 = vmatprep.subr.bf16.mxu0 %v2385_v19 }
  0xc9   :  { %1186 = vmatpush2.bf16.msra.mxu1 %v2380_v54 }
  0xca   :  { %1187 = vmatprep.subr.bf16.mxu1 %v2388_v38 }
  0xcb   :  { %1147 = vmatpush2.bf16.msra.mxu0 %v2383_v58 }
  0xcc   :  { %1148 = vmatprep.subr.bf16.mxu0 %v2391_v61 }
  0xcd   :  { %1188 = vmatpush2.bf16.msra.mxu1 %v2386_v62 }
  0xce   :  { %1189 = vmatprep.subr.bf16.mxu1 %v2394_v9 }
  0xcf   :  { %1149 = vmatpush2.bf16.msra.mxu0 %v2389_v0 }
  0xd0   :  { %1150 = vmatprep.subr.bf16.mxu0 %v2397_v10 }
  0xd1   :  { %1190 = vmatpush2.bf16.msra.mxu1 %v2392_v42  ;;  %v1223_v42 = vld [vmem:[%s3269_s6] sm:$0x3]  ;;  %s2484_s6 = smov 64  }
  0xd2   :  { %1191 = vmatprep.subr.bf16.mxu1 %v2400_v4 }
  0xd3   :  { %1151 = vmatpush2.bf16.msra.mxu0 %v2395_v5 }
  0xd4   :  { %2123 = vmatprep.subr.bf16.mxu0 %v2481_v17 }
  0xd5   :  { %1192 = vmatpush2.bf16.msra.mxu1 %v2398_v46 }
  0xd6   :  { %1153 = vmatmul.mubr.bf16.vlgmr.msra.gmra.mxu0 %v792_v20  ;;  %2131 = vmatprep.subr.bf16.mxu1 %v2481_v17 }
  0xd7   :  { %2124 = vmatpush3.bf16.msra.mxu0 %v3111_v16  ;;  %2127 = vmatprep.mubr.msk.bf16.mxu0 %vm2482_vm0, %v2481_v17 }
  0xd8   :  { %1194 = vmatmul.mubr.bf16.vlgmr.msra.gmra.mxu1 %v794_v48  ;;  %2125 = vmatprep.subr.bf16.mxu0 %v2481_v17 }
  0xd9   :  { %2132 = vmatpush3.bf16.msra.mxu1 %v3111_v16  ;;  %2135 = vmatprep.mubr.msk.bf16.mxu1 %vm2482_vm0, %v2481_v17 }
  0xda   :  { %2133 = vmatprep.subr.bf16.mxu1 %v2481_v17 }
  0xdb   :  { %2126 = vmatpush3.bf16.msra.mxu0 %v3119_v21 }
  0xdc   :  { %2139 = vmatprep.subr.bf16.mxu0 %v2481_v17 }
  0xdd   :  { %2134 = vmatpush3.bf16.msra.mxu1 %v3119_v21 }
  0xde   :  { %2128 = vmatmul.mubr.msk.bf16.vlgmr.msra.gmra.mxu0 %vm1237_vm1, %v1224_v13  ;;  %2147 = vmatprep.subr.bf16.mxu1 %v2481_v17 }
  0xdf   :  { %2140 = vmatpush3.bf16.msra.mxu0 %v3111_v16  ;;  %2143 = vmatprep.mubr.msk.bf16.mxu0 %vm2482_vm0, %v2481_v17 }
  0xe0   :  { %2141 = vmatprep.subr.bf16.mxu0 %v2481_v17 }
  0xe3   :  { %2142 = vmatpush3.bf16.msra.mxu0 %v3119_v21 }
  0xe4   :  { %2155 = vmatprep.subr.bf16.mxu0 %v2481_v17 }
 0x156   :  { %v572_v34 = vpop.f32.mrf.mxu0 }
 0x157   :  { %v573_v37 = vadd.f32 %v572_v34, %v211_v31 }
 0x158   :  { %v613_v14 = vpop.f32.mrf.mxu1  ;;  %v574_v39 = vpop.f32.mrf.mxu0 }
 0x159   :  { %v3146_v40 = vadd.f32 %v613_v14, %v573_v37  ;;  %v575_v35 = vadd.f32 %v574_v39, %v215_v28 }
 0x15a   :  { %v615_v41 = vpop.f32.mrf.mxu1  ;;  %v576_v29 = vpop.f32.mrf.mxu0 }
 0x15b   :  { %v616_v43 = vadd.f32 %v615_v41, %v575_v35 }
 0x15c   :  { %v617_v44 = vpop.f32.mrf.mxu1  ;;  %v577_v8 = vpop.f32.mrf.mxu0 }
 0x15d   :  { %v1204_v18 = vrot.slane %v616_v43, 2 }
 0x15e   :  { %v618_v23 = vpop.f32.mrf.mxu1 }
 0x15f   :  { %v1206_v55 = vadd.f32 %v1204_v18, %v616_v43 }
 0x196   :  { %v1154_v36 = vpop.f32.mrf.mxu0 }
 0x197   :  { %v1155_v50 = vadd.f32 %v1154_v36, %v781_v47 }
 0x198   :  { %v1195_v51 = vpop.f32.mrf.mxu1  ;;  %v1156_v52 = vpop.f32.mrf.mxu0 }
 0x199   :  { %v3151_v19 = vadd.f32 %v1195_v51, %v1155_v50  ;;  %v1157_v26 = vadd.f32 %v1156_v52, %v785_v49 }
 0x19a   :  { %v1197_v53 = vpop.f32.mrf.mxu1  ;;  %v1158_v54 = vpop.f32.mrf.mxu0 }
 0x19b   :  { %v1198_v56 = vadd.f32 %v1197_v53, %v1157_v26 }
 0x19c   :  { %v1199_v38 = vpop.f32.mrf.mxu1  ;;  %v1159_v57 = vpop.f32.mrf.mxu0 }
 0x19d   :  { %v1207_v58 = vadd.f32 %v1206_v55, %v1198_v56  ;;  %v1209_v59 = vrot.slane %v1198_v56, 2  ;;  %v1212_v63 = vrot.slane %v1198_v56, 4  ;;  %v1215_v25 = vrot.slane %v1198_v56, 6 }
 0x19e   :  { %v1200_v60 = vpop.f32.mrf.mxu1  ;;  %v1275_v32 = vpop.f32.mrf.mxu0 }
 0x19f   :  { %v1281_v61 = vadd.f32 %v1275_v32, %v3146_v40  ;;  %v1211_v62 = vadd.f32 %v1209_v59, %v1207_v58 }
 0x1a0   :  { %v2129_v33 = vpop.f32.mrf.mxu0 }
 0x1a1   :  { %2403 = vtanh.f32 %v1281_v61  ;;  %v1214_v9 = vadd.f32 %v1212_v63, %v1211_v62  ;;  %v2079_v2 = vmul.f32 -1.442695, %v1281_v61 }
 0x1a2   :  { %v1278_v0 = vpop.f32.mrf.mxu0 }
 0x1a3   :  { %v3154_v1 = vadd.f32 %v1215_v25, %v1214_v9  ;;  %2405 = vpow2.f32 %v2079_v2 }
 0x1a4   :  { %v2130_v10 = vpop.f32.mrf.mxu0 }
 0x1ae   :  { %v2404_v30 = vpop.eup %2403 }
 0x1af   :  { %1295 = vrot.lane.b32.xlu1 %v2404_v30, %s2483_s3 }
 0x1b0   :  { %v2406_v3 = vpop.eup %2405 }
 0x1b1   :  { %v1285_v4 = vadd.f32 1.0, %v2406_v3 }
 0x1b3   :  { %1290 = vrot.lane.b32.xlu1 %v1223_v42, %s2483_s3  ;;  %2407 = vrcp.f32 %v1285_v4 }
 0x1c0   :  { %v2408_v5 = vpop.eup %2407 }
 0x221   :  { %v1296_v6 = vpop.permute.xlu1 %1295 }
 0x222   :  { %v1298_v7 = vmul.f32 %v2408_v5, %v1296_v6 }
 0x224   :  { %1300 = vrot.lane.b32.xlu0 %v1298_v7, %s2483_s3 }
 0x225   :  { %v1291_v46 = vpop.permute.xlu1 %1290 }
 0x226   :  { %v1293_v11 = vmul.f32 %v2408_v5, %v1291_v46 }
 0x296   :  { %v1301_v20 = vpop.permute.xlu0 %1300 }
 0x297   :  { %v1303_v48 = vadd.f32 %v1301_v20, %v1293_v11 }
 0x299   :  { %2409 = vtanh.f32 %v1303_v48  ;;  %v1370_v23 = vrot.slane %v1303_v48, 6 }
 0x2a6   :  { %v2410_v12 = vpop.eup %2409 }
 0x2a7   :  { %1306 = vrot.lane.b32.xlu1 %v2410_v12, %s2483_s3 }
 0x319   :  { %v1307_v13 = vpop.permute.xlu1 %1306 }
 0x31a   :  { %v3163_v22 = vmul.f32 %v2408_v5, %v1307_v13 }
 0x31c   :  { %v1311_v24 = vpack.c.bf16 %v3163_v22, %v3163_v22 }
 0x31e   :  { %1313 = vrot.lane.b32.xlu0 %v1311_v24, %s2484_s6 }
 0x390   :  { %v1314_v15 = vpop.permute.xlu0 %1313 }
 0x391   :  { %2136 = vmatmul.mubr.msk.bf16.vlgmr.msra.gmra.mxu1 %vm1237_vm1, %v1314_v15 }
 0x392   :  { %2148 = vmatpush3.bf16.msra.mxu1 %v3111_v16  ;;  %2151 = vmatprep.mubr.msk.bf16.mxu1 %vm2482_vm0, %v2481_v17 }
 0x393   :  { %2149 = vmatprep.subr.bf16.mxu1 %v2481_v17 }
 0x396   :  { %2150 = vmatpush3.bf16.msra.mxu1 %v3119_v21 }
 0x397   :  { %2163 = vmatprep.subr.bf16.mxu1 %v2481_v17 }
 0x451   :  { %v1352_v27 = vpop.f32.mrf.mxu1 }
 0x452   :  { %v1359_v31 = vrot.slane %v1352_v27, 6 }
 0x453   :  { %v2137_v28 = vpop.f32.mrf.mxu1 }
 0x454   :  { %v1361_v34 = vadd.f32 %v1359_v31, %v3146_v40 }
 0x455   :  { %v1355_v37 = vpop.f32.mrf.mxu1 }
 0x456   :  { %2411 = vtanh.f32 %v1361_v34  ;;  %v2081_v35 = vmul.f32 -1.442695, %v1361_v34 }
 0x457   :  { %v2138_v14 = vpop.f32.mrf.mxu1 }
 0x458   :  { %2413 = vpow2.f32 %v2081_v35 }
 0x463   :  { %v2412_v39 = vpop.eup %2411 }
 0x464   :  { %1374 = vrot.lane.b32.xlu1 %v2412_v39, %s2483_s3 }
 0x465   :  { %v2414_v41 = vpop.eup %2413 }
 0x466   :  { %v1365_v29 = vadd.f32 1.0, %v2414_v41 }
 0x468   :  { %2415 = vrcp.f32 %v1365_v29 }
 0x475   :  { %v2416_v43 = vpop.eup %2415 }
 0x476   :  { %v1372_v45 = vmul.f32 %v2416_v43, %v1370_v23 }
 0x4d6   :  { %v1375_v44 = vpop.permute.xlu1 %1374 }
 0x4d7   :  { %v1377_v8 = vmul.f32 %v2416_v43, %v1375_v44 }
 0x4d9   :  { %1379 = vrot.lane.b32.xlu0 %v1377_v8, %s2483_s3 }
 0x54b   :  { %v1380_v47 = vpop.permute.xlu0 %1379 }
 0x54c   :  { %v1382_v40 = vadd.f32 %v1380_v47, %v1372_v45 }
 0x54e   :  { %2417 = vtanh.f32 %v1382_v40  ;;  %v1450_v62 = vrot.slane %v1382_v40, 2 }
 0x55b   :  { %v2418_v49 = vpop.eup %2417 }
 0x55c   :  { %1385 = vrot.lane.b32.xlu1 %v2418_v49, %s2483_s3 }
 0x5ce   :  { %v1386_v36 = vpop.permute.xlu1 %1385 }
 0x5cf   :  { %v1388_v18 = vmul.f32 %v2416_v43, %v1386_v36 }
 0x5d1   :  { %v1393_v50 = vpack.c.bf16 %v1388_v18, %v1388_v18  ;;  %v1390_v0 = vrot.slane %v1388_v18, 2 }
 0x5d3   :  { %v1395_v51 = vrot.slane %v1393_v50, 1  ;;  %v1392_v30 = vadd.f32 %v1390_v0, %v3163_v22 }
 0x5d5   :  { %1396 = vrot.lane.b32.xlu0 %v1395_v51, %s2484_s6 }
 0x647   :  { %v1397_v52 = vpop.permute.xlu0 %1396 }
 0x648   :  { %2144 = vmatmul.mubr.msk.bf16.vlgmr.msra.gmra.mxu0 %vm1237_vm1, %v1397_v52 }
 0x649   :  { %2156 = vmatpush3.bf16.msra.mxu0 %v3111_v16  ;;  %2159 = vmatprep.mubr.msk.bf16.mxu0 %vm2482_vm0, %v2481_v17 }
 0x64a   :  { %2157 = vmatprep.subr.bf16.mxu0 %v2481_v17 }
 0x64d   :  { %2158 = vmatpush3.bf16.msra.mxu0 %v3119_v21 }
 0x64e   :  { %2171 = vmatprep.subr.mxu0 %v2481_v17 }
 0x708   :  { %v1435_v26 = vpop.f32.mrf.mxu0 }
 0x709   :  { %v1441_v53 = vadd.f32 %v1435_v26, %v3151_v19 }
 0x70a   :  { %v2145_v54 = vpop.f32.mrf.mxu0 }
 0x70b   :  { %2419 = vtanh.f32 %v1441_v53  ;;  %v2083_v57 = vmul.f32 -1.442695, %v1441_v53 }
 0x70c   :  { %v1438_v55 = vpop.f32.mrf.mxu0 }
 0x70d   :  { %2421 = vpow2.f32 %v2083_v57 }
 0x70e   :  { %v2146_v56 = vpop.f32.mrf.mxu0 }
 0x718   :  { %v2420_v38 = vpop.eup %2419 }
 0x719   :  { %1454 = vrot.lane.b32.xlu1 %v2420_v38, %s2483_s3 }
 0x71a   :  { %v2422_v58 = vpop.eup %2421 }
 0x71b   :  { %v1445_v59 = vadd.f32 1.0, %v2422_v58 }
 0x71d   :  { %2423 = vrcp.f32 %v1445_v59 }
 0x72a   :  { %v2424_v60 = vpop.eup %2423 }
 0x72b   :  { %v1452_v63 = vmul.f32 %v2424_v60, %v1450_v62 }
 0x78b   :  { %v1455_v32 = vpop.permute.xlu1 %1454 }
 0x78c   :  { %v1457_v61 = vmul.f32 %v2424_v60, %v1455_v32 }
 0x78e   :  { %1459 = vrot.lane.b32.xlu0 %v1457_v61, %s2483_s3 }
 0x800   :  { %v1460_v33 = vpop.permute.xlu0 %1459 }
 0x801   :  { %v1462_v9 = vadd.f32 %v1460_v33, %v1452_v63 }
 0x803   :  { %2425 = vtanh.f32 %v1462_v9  ;;  %v1529_v15 = vrot.slane %v1462_v9, 6 }
 0x810   :  { %v2426_v25 = vpop.eup %2425 }
 0x811   :  { %1465 = vrot.lane.b32.xlu1 %v2426_v25, %s2483_s3 }
 0x883   :  { %v1466_v10 = vpop.permute.xlu1 %1465 }
 0x884   :  { %v1468_v42 = vmul.f32 %v2424_v60, %v1466_v10 }
 0x886   :  { %v1469_v2 = vadd.f32 %v1468_v42, %v1392_v30  ;;  %v1470_v3 = vpack.c.bf16 %v1468_v42, %v1468_v42 }
 0x888   :  { %1472 = vrot.lane.b32.xlu0 %v1470_v3, %s2484_s6 }
 0x8fa   :  { %v1473_v4 = vpop.permute.xlu0 %1472 }
 0x8fb   :  { %2152 = vmatmul.mubr.msk.bf16.vlgmr.msra.gmra.mxu1 %vm1237_vm1, %v1473_v4 }
 0x8fc   :  { %2164 = vmatpush3.bf16.msra.mxu1 %v3111_v16  ;;  %2167 = vmatprep.mubr.msk.bf16.mxu1 %vm2482_vm0, %v2481_v17 }
 0x8fd   :  { %2165 = vmatprep.subr.bf16.mxu1 %v2481_v17 }
 0x900   :  { %2166 = vmatpush3.bf16.msra.mxu1 %v3119_v21 }
 0x901   :  { %2182 = vmatprep.subr.mxu1 %v2481_v17 }
 0x9bb   :  { %v1511_v5 = vpop.f32.mrf.mxu1 }
 0x9bc   :  { %v1518_v6 = vrot.slane %v1511_v5, 6 }
 0x9bd   :  { %v2153_v7 = vpop.f32.mrf.mxu1 }
 0x9be   :  { %v1520_v46 = vadd.f32 %v1518_v6, %v3151_v19 }
 0x9bf   :  { %v1514_v11 = vpop.f32.mrf.mxu1 }
 0x9c0   :  { %2427 = vtanh.f32 %v1520_v46  ;;  %v2085_v16 = vmul.f32 -1.442695, %v1520_v46 }
 0x9c1   :  { %v2154_v20 = vpop.f32.mrf.mxu1 }
 0x9c2   :  { %2429 = vpow2.f32 %v2085_v16  ;;  %v1723_v20 = vld [vmem:[%s3271_s8 + $0x18] sm:$0xff]  ;;  %v1721_v16 = vld [vmem:[%s3271_s8 + $0x8] sm:$0xff] }
 0x9cd   :  { %v2428_v48 = vpop.eup %2427 }
 0x9ce   :  { %1533 = vrot.lane.b32.xlu1 %v2428_v48, %s2483_s3  ;;  %v1722_v48 = vld [vmem:[%s3271_s8 + $0x10] sm:$0xff] }
 0x9cf   :  { %v2430_v12 = vpop.eup %2429 }
 0x9d0   :  { %v1524_v13 = vadd.f32 1.0, %v2430_v12 }
 0x9d2   :  { %2431 = vrcp.f32 %v1524_v13  ;;  %v1720_v13 = vld [vmem:[%s3271_s8] sm:$0xff] }
 0x9df   :  { %v2432_v22 = vpop.eup %2431 }
 0x9e0   :  { %v1531_v27 = vmul.f32 %v2432_v22, %v1529_v15 }
 0xa40   :  { %v1534_v21 = vpop.permute.xlu1 %1533 }
 0xa41   :  { %v1536_v24 = vmul.f32 %v2432_v22, %v1534_v21 }
 0xa43   :  { %1538 = vrot.lane.b32.xlu0 %v1536_v24, %s2483_s3 }
 0xab5   :  { %v1539_v31 = vpop.permute.xlu0 %1538 }
 0xab6   :  { %v1541_v28 = vadd.f32 %v1539_v31, %v1531_v27 }
 0xab8   :  { %2433 = vtanh.f32 %v1541_v28  ;;  %v1612_v53 = vrot.slane %v1541_v28, 6  ;;  %v1819_v28 = vld [vmem:[%s3273_s10 + $0x18] sm:$0xff] }
 0xac5   :  { %v2434_v34 = vpop.eup %2433 }
 0xac6   :  { %1544 = vrot.lane.b32.xlu1 %v2434_v34, %s2483_s3  ;;  %v1818_v34 = vld [vmem:[%s3273_s10 + $0x10] sm:$0xff] }
 0xb38   :  { %v1545_v37 = vpop.permute.xlu1 %1544 }
 0xb39   :  { %v1547_v14 = vmul.f32 %v2432_v22, %v1545_v37  ;;  %v1817_v37 = vld [vmem:[%s3273_s10 + $0x8] sm:$0xff] }
 0xb3b   :  { %v1549_v39 = vrot.slane %v1547_v14, 2  ;;  %v1552_v35 = vpack.c.bf16 %v1547_v14, %v1547_v14  ;;  %v1816_v14 = vld [vmem:[%s3273_s10] sm:$0xff] }
 0xb3d   :  { %v1551_v41 = vadd.f32 %v1549_v39, %v1469_v2  ;;  %v1554_v29 = vrot.slane %v1552_v35, 1  ;;  %v1719_v39 = vmul.f32 0.16666667, %v3154_v1 }
 0xb3f   :  { %1555 = vrot.lane.b32.xlu0 %v1554_v29, %s2484_s6 }
 0xbb1   :  { %v1556_v43 = vpop.permute.xlu0 %1555 }
 0xbb2   :  { %2160 = vmatmul.mubr.msk.bf16.vlgmr.msra.gmra.mxu0 %vm1237_vm1, %v1556_v43 }
 0xbb3   :  { %2179 = vmatprep.mubr.msk.f32.mxu0 %vm2482_vm0, %v2481_v17  ;;  %2172 = vmatpush3.msra.mxu0 %v1723_v20 }
 0xbb4   :  { %2173 = vmatprep.subr.mxu0 %v2481_v17 }
 0xbb5   :  { %2174 = vmatpush3.msra.mxu0 %v1722_v48 }
 0xbb6   :  { %2175 = vmatprep.subr.mxu0 %v2481_v17 }
 0xbb7   :  { %2176 = vmatpush3.msra.mxu0 %v1721_v16 }
 0xbb8   :  { %2177 = vmatprep.subr.mxu0 %v2481_v17 }
 0xbb9   :  { %2178 = vmatpush3.msra.mxu0 %v1720_v13 }
 0xc72   :  { %v1594_v44 = vpop.f32.mrf.mxu0 }
 0xc73   :  { %v1601_v8 = vrot.slane %v1594_v44, 4 }
 0xc74   :  { %v2161_v23 = vpop.f32.mrf.mxu0 }
 0xc75   :  { %v1603_v45 = vadd.f32 %v1601_v8, %v3151_v19 }
 0xc76   :  { %v1597_v47 = vpop.f32.mrf.mxu0 }
 0xc77   :  { %2435 = vtanh.f32 %v1603_v45  ;;  %v2087_v36 = vmul.f32 -1.442695, %v1603_v45 }
 0xc78   :  { %v2162_v40 = vpop.f32.mrf.mxu0 }
 0xc79   :  { %2437 = vpow2.f32 %v2087_v36 }
 0xc84   :  { %v2436_v49 = vpop.eup %2435 }
 0xc85   :  { %1616 = vrot.lane.b32.xlu1 %v2436_v49, %s2483_s3 }
 0xc86   :  { %v2438_v18 = vpop.eup %2437 }
 0xc87   :  { %v1607_v50 = vadd.f32 1.0, %v2438_v18 }
 0xc89   :  { %2439 = vrcp.f32 %v1607_v50 }
 0xc96   :  { %v2440_v51 = vpop.eup %2439 }
 0xc97   :  { %v1614_v54 = vmul.f32 %v2440_v51, %v1612_v53 }
 0xcf7   :  { %v1617_v52 = vpop.permute.xlu1 %1616 }
 0xcf8   :  { %v1619_v26 = vmul.f32 %v2440_v51, %v1617_v52 }
 0xcfa   :  { %1621 = vrot.lane.b32.xlu0 %v1619_v26, %s2483_s3 }
 0xd6c   :  { %v1622_v55 = vpop.permute.xlu0 %1621 }
 0xd6d   :  { %v1624_v56 = vadd.f32 %v1622_v55, %v1614_v54 }
 0xd6f   :  { %2441 = vtanh.f32 %v1624_v56  ;;  %v1695_v7 = vrot.slane %v1624_v56, 6 }
 0xd7c   :  { %v2442_v38 = vpop.eup %2441 }
 0xd7d   :  { %1627 = vrot.lane.b32.xlu1 %v2442_v38, %s2483_s3 }
 0xdef   :  { %v1628_v57 = vpop.permute.xlu1 %1627 }
 0xdf0   :  { %v1630_v58 = vmul.f32 %v2440_v51, %v1628_v57 }
 0xdf2   :  { %v1632_v59 = vrot.slane %v1630_v58, 4  ;;  %v1635_v60 = vpack.c.bf16 %v1630_v58, %v1630_v58 }
 0xdf4   :  { %v1634_v32 = vadd.f32 %v1632_v59, %v1551_v41  ;;  %v1637_v61 = vrot.slane %v1635_v60, 2  ;;  %v2091_v41 = vld [vmem:[%s3272_s9] ss:$0 sm:$0xff]  ;;  %s2455_s9 = scalar_lea.vmem %s1909_s7, 32 }
 0xdf5   :  { %p2456_p0 = scmp.ne.s32.totalorder %s1909_s7, %s2455_s9  ;;  %p2461_p2 = scmp.lt.s32.totalorder %s2455_s9, %s2455_s9 }
 0xdf6   :  { %1638 = vrot.lane.b32.xlu0 %v1637_v61, %s2484_s6 }
 0xdf7   :  { %p2462_p3 = por %p2461_p2, %p2460_p1 }
 0xdf9   :  { %p2463_p4 = pnand %p2462_p3, %p2456_p0 }
 0xe68   :  { %v1639_v62 = vpop.permute.xlu0 %1638 }
 0xe69   :  { %2168 = vmatmul.mubr.msk.bf16.vlgmr.msra.gmra.mxu1 %vm1237_vm1, %v1639_v62 }
 0xe6a   :  { %2190 = vmatprep.mubr.msk.f32.mxu1 %vm2482_vm0, %v2481_v17  ;;  %2183 = vmatpush3.msra.mxu1 %v1819_v28 }
 0xe6b   :  { %2184 = vmatprep.subr.mxu1 %v2481_v17 }
 0xe6c   :  { %2185 = vmatpush3.msra.mxu1 %v1818_v34 }
 0xe6d   :  { %2186 = vmatprep.subr.mxu1 %v2481_v17 }
 0xe6e   :  { %2187 = vmatpush3.msra.mxu1 %v1817_v37 }
 0xe6f   :  { %2188 = vmatprep.subr.mxu1 %v2481_v17  ;;  %v2093_v17 = vld [vmem:[%s3274_s11] ss:$0 sm:$0xff] }
 0xe70   :  { %2189 = vmatpush3.msra.mxu1 %v1816_v14 }
 0xf29   :  { %v1677_v63 = vpop.f32.mrf.mxu1 }
 0xf2a   :  { %v1684_v33 = vrot.slane %v1677_v63, 2 }
 0xf2b   :  { %v2169_v9 = vpop.f32.mrf.mxu1 }
 0xf2c   :  { %v1686_v25 = vadd.f32 %v1684_v33, %v3151_v19 }
 0xf2d   :  { %v1680_v0 = vpop.f32.mrf.mxu1 }
 0xf2e   :  { %2443 = vtanh.f32 %v1686_v25  ;;  %v2089_v42 = vmul.f32 -1.442695, %v1686_v25 }
 0xf2f   :  { %v2170_v10 = vpop.f32.mrf.mxu1 }
 0xf30   :  { %2445 = vpow2.f32 %v2089_v42 }
 0xf3b   :  { %v2444_v30 = vpop.eup %2443 }
 0xf3c   :  { %1699 = vrot.lane.b32.xlu1 %v2444_v30, %s2483_s3 }
 0xf3d   :  { %v2446_v2 = vpop.eup %2445 }
 0xf3e   :  { %v1690_v3 = vadd.f32 1.0, %v2446_v2 }
 0xf40   :  { %2447 = vrcp.f32 %v1690_v3 }
 0xf4d   :  { %v2448_v4 = vpop.eup %2447 }
 0xf4e   :  { %v1697_v46 = vmul.f32 %v2448_v4, %v1695_v7 }
 0xfae   :  { %v1700_v5 = vpop.permute.xlu1 %1699 }
 0xfaf   :  { %v1702_v6 = vmul.f32 %v2448_v4, %v1700_v5 }
 0xfb1   :  { %1704 = vrot.lane.b32.xlu0 %v1702_v6, %s2483_s3 }
0x1023   :  { %v1705_v11 = vpop.permute.xlu0 %1704 }
0x1024   :  { %v1707_v19 = vadd.f32 %v1705_v11, %v1697_v46 }
0x1026   :  { %2449 = vtanh.f32 %v1707_v19 }
0x1033   :  { %v2450_v12 = vpop.eup %2449 }
0x1034   :  { %1710 = vrot.lane.b32.xlu1 %v2450_v12, %s2483_s3 }
0x10a6   :  { %v1711_v22 = vpop.permute.xlu1 %1710 }
0x10a7   :  { %v1713_v21 = vmul.f32 %v2448_v4, %v1711_v22 }
0x10a9   :  { %v1715_v24 = vrot.slane %v1713_v21, 6 }
0x10ab   :  { %v1717_v15 = vadd.f32 %v1715_v24, %v1634_v32 }
0x10ad   :  { %v1718_v27 = vmul.f32 0.16666667, %v1717_v15 }
0x10af   :  { %1725 = vrot.lane.b32.xlu0 %v1718_v27, %s2484_s6 }
0x1121   :  { %v1726_v31 = vpop.permute.xlu0 %1725 }
0x1122   :  { %2180 = vmatmul.mubr.msk.f32.vlgmr.msra.gmra.mxu0 %vm1237_vm1, %v1726_v31 }
0x11e2   :  { %v1795_v35 = vpop.f32.mrf.mxu0 }
0x11e3   :  { %v1799_v29 = vadd.f32 %v1795_v35, %v1719_v39 }
0x11e4   :  { %v2181_v43 = vpop.f32.mrf.mxu0 }
0x11e5   :  { %v1807_v44 = vadd.f32 %v2091_v41, %v1799_v29 }
0x11e7   :  { %v2092_v8 = vmul.f32 -1.442695, %v1807_v44 }
0x11e9   :  { %2451 = vpow2.f32 %v2092_v8 }
0x11f6   :  { %v2452_v23 = vpop.eup %2451 }
0x11f7   :  { %v1811_v45 = vadd.f32 1.0, %v2452_v23 }
0x11f9   :  { %2453 = vrcp.f32 %v1811_v45 }
0x1206   :  { %v2454_v47 = vpop.eup %2453 }
0x1207   :  { %v1815_v40 = vmul.f32 %v2454_v47, %v1726_v31 }
0x1209   :  { %2191 = vmatmul.mubr.msk.f32.vlgmr.msra.gmra.mxu1 %vm1237_vm1, %v1815_v40 }
0x12c9   :  { %v1896_v1 = vpop.f32.mrf.mxu1 }
0x12ca   :  { %v1897_v49 = vadd.f32 %v2093_v17, %v1896_v1 }
0x12cb   :  { %v2192_v36 = vpop.f32.mrf.mxu1 }
0x12cc   :  { %1901 = vst.msk [vmem:[#allocation2] sm:$0x3] %vm1900_vm2, %v1897_v49 }
0x12cd   :  { %2466 = shalt.err (!%p2463_p4)
}
0x12ce   :  { %1911 = dma.vmem_to_hbm [thread:$0]  %s1909_s7, 32, %s3275_s12, [#allocation3]  }
0x12cf   :  { %2475 = dma.done.wait [#allocation3], 32  }
0x12d0   :  { %2476 = vsyncadd [#allocation3], 4294967264 }
0x12d1   :  { %1915 = vsyncpa [#allocation3], 1 }

</bundles_post_ra>
